<compile_context>
chip_gen: v5e
topology: v5e:2x2
jax: 0.10.0
libtpu: 0.0.40
codegen_flags: <defaults>
</compile_context>

<pallas_src>
import numpy as np
import jax
import jax.numpy as jnp
from jax.experimental import pallas as pl
from jax.experimental.pallas import tpu as pltpu


def _relu(v):
    return jnp.maximum(v, 0.0)


# ---------------------------------------------------------------------------
# Fused Pallas kernel (one grid step == one chunk of GRAPHS_PER_CHUNK graphs):
#   GCN x2 -> global mean pool -> (cell tail | drug_nn) stacked -> fcn head
# ---------------------------------------------------------------------------
def _graphtab_kernel(x_ref, adj_ref, seg_ref, drug_ref,
                     w1_ref, b1_ref, w2_ref, b2_ref,
                     wcd1_ref, bcd1_ref, wcd2_ref, bcd2_ref,
                     wf1c_ref, wf1d_ref, bf1_ref, wf2_ref, bf2_ref,
                     wf3t_ref, bf3_ref,
                     out_ref):
    f32, bf16 = jnp.float32, jnp.bfloat16
    g = drug_ref.shape[0]          # graphs in this chunk
    n = adj_ref.shape[1]           # nodes in this chunk

    adj = adj_ref[0]                                         # [n, n] bf16, A + I (0/1 exact)
    deg = jnp.sum(adj.astype(f32), axis=1, keepdims=True)    # [n, 1] f32
    dinv = jax.lax.rsqrt(deg)                                # D^-1/2 (deg >= 1: self-loops), EUP

    # --- GCNConv(4 -> 256), reassociated: ((A_hat @ X) @ W1) + b1 -----------
    xs = (dinv * x_ref[...]).astype(bf16)                                    # [n, 4]
    ax = dinv * jnp.dot(adj, xs, preferred_element_type=f32)                 # [n, 4] f32
    h1 = _relu(jnp.dot(ax.astype(bf16), w1_ref[...],
                       preferred_element_type=f32) + b1_ref[...])            # [n, 256]

    # --- GCNConv(256 -> 256): A_hat @ (H1 @ W2) + b2 --------------------------
    hw = jnp.dot(h1.astype(bf16), w2_ref[...], preferred_element_type=f32)   # [n, 256]
    h2 = _relu(dinv * jnp.dot(adj, (dinv * hw).astype(bf16),
                              preferred_element_type=f32) + b2_ref[...])     # [n, 256]

    # --- global_mean_pool: normalized one-hot (1/counts folded into the LHS) --
    seg = seg_ref[0]                                          # [1, n] int32 (chunk-local ids)
    gids = jax.lax.broadcasted_iota(jnp.int32, (g, n), 0)     # [g, n]
    one_hot = (gids == seg).astype(f32)
    counts = jnp.maximum(jnp.sum(one_hot, axis=1, keepdims=True), 1.0)
    pool_w = (one_hot / counts).astype(bf16)                  # [g, n]
    pooled = jnp.dot(pool_w, h2.astype(bf16), preferred_element_type=f32)    # [g, 256]

    # --- cell_emb tail + drug_nn stacked as one [2g, 256] operand -------------
    # wcd1 = [wc1 | wd1], wcd2 = block-diag(wc2, wd2); only the cell quadrant
    # (rows 0:g, cols 0:128) and drug quadrant (rows g:2g, cols 128:256) are read.
    stacked = jnp.concatenate([pooled, drug_ref[...]], axis=0).astype(bf16)  # [2g, 256]
    s1 = _relu(jnp.dot(stacked, wcd1_ref[...],
                       preferred_element_type=f32) + bcd1_ref[...])          # [2g, 256]
    s2 = _relu(jnp.dot(s1.astype(bf16), wcd2_ref[...],
                       preferred_element_type=f32) + bcd2_ref[...])          # [2g, 256]
    cell_emb = s2[0:g, 0:128]                                 # [g, 128]
    drug_emb = s2[g:2 * g, 128:256]                           # [g, 128]

    # --- fcn head: cat([cell,drug]) @ wf1 done as two half matmuls ------------
    h = _relu(jnp.dot(cell_emb.astype(bf16), wf1c_ref[...], preferred_element_type=f32)
              + jnp.dot(drug_emb.astype(bf16), wf1d_ref[...], preferred_element_type=f32)
              + bf1_ref[...])                                                # [g, 128]
    h = _relu(jnp.dot(h.astype(bf16), wf2_ref[...],
                      preferred_element_type=f32) + bf2_ref[...])            # [g, 64]
    # Final Linear(64,1) as VPU multiply + lane reduction (no 1-lane MXU matmul).
    out_ref[...] = (jnp.sum(h * wf3t_ref[...], axis=-1, keepdims=True)
                    + bf3_ref[...])                                          # [g, 1]


# ---------------------------------------------------------------------------
# Parameter packing (one-time re-layout + bf16 cast of the MXU weights)
# ---------------------------------------------------------------------------
def pack_params(p):
    bf16 = jnp.bfloat16
    z = jnp.zeros((128, 128), jnp.float32)
    q = {}
    q["gcn_w1"] = p["gcn_w1"].astype(bf16)
    q["gcn_b1"] = p["gcn_b1"]
    q["gcn_w2"] = p["gcn_w2"].astype(bf16)
    q["gcn_b2"] = p["gcn_b2"]
    q["w_cd1"] = jnp.concatenate([p["wc1"], p["wd1"]], axis=1).astype(bf16)   # [256, 256]
    q["b_cd1"] = jnp.concatenate([p["bc1"], p["bd1"]], axis=1)                # [1, 256]
    q["w_cd2"] = jnp.block([[p["wc2"], z], [z, p["wd2"]]]).astype(bf16)       # [256, 256]
    q["b_cd2"] = jnp.concatenate([p["bc2"], p["bd2"]], axis=1)                # [1, 256]
    q["wf1_c"] = p["wf1"][0:128, :].astype(bf16)                              # [128, 128]
    q["wf1_d"] = p["wf1"][128:256, :].astype(bf16)                            # [128, 128]
    q["bf1"] = p["bf1"]
    q["wf2"] = p["wf2"].astype(bf16)                                          # [128, 64]
    q["bf2"] = p["bf2"]
    q["wf3_t"] = p["wf3"].T                                                   # [1, 64] f32 (VPU)
    q["bf3"] = p["bf3"]                                                       # [1, 1]
    return q


# ---------------------------------------------------------------------------
# Wrapper: builds the per-chunk dense block-diagonal adjacency + local seg ids
# (XLA glue), then one pallas_call with a grid over graph chunks.
# ---------------------------------------------------------------------------
def graphtab_forward(x_nodes, edge_index, batch, drug, packed, num_graphs,
                     graphs_per_chunk):
    n_total, f_in = x_nodes.shape
    b_total = num_graphs
    drug_dim = drug.shape[1]
    assert b_total % graphs_per_chunk == 0
    num_chunks = b_total // graphs_per_chunk
    assert n_total % num_chunks == 0
    nc = n_total // num_chunks                 # nodes per chunk (128 here -> fills MXU rows)
    assert nc % 8 == 0

    # NOTE: assumes PyG-style sorted batches with equal-size graphs, so chunk c
    # owns graphs [c*G, (c+1)*G) and node rows [c*nc, (c+1)*nc).
    # TODO(synk): ragged graph sizes need per-chunk node offsets via scalar prefetch.
    src, dst = edge_index[0], edge_index[1]
    chunk_of_edge = dst // nc
    adj = jnp.zeros((num_chunks, nc, nc), jnp.float32)
    adj = adj.at[chunk_of_edge, dst % nc, src % nc].add(1.0)
    adj = adj + jnp.eye(nc, dtype=jnp.float32)[None]          # self loops
    adj = adj.astype(jnp.bfloat16)                            # 0/1 exact; halves DMA bytes
    seg_local = (batch.astype(jnp.int32) % graphs_per_chunk).reshape(num_chunks, 1, nc)

    row_chunk = lambda i: (i, 0)          # per-chunk 2-D operands
    chunk3 = lambda i: (i, 0, 0)          # per-chunk 3-D operands
    def _pinned(a):                       # weights: constant block index -> fetched once
        return (a, pl.BlockSpec(a.shape, lambda i, _nd=a.ndim: (0,) * _nd))

    operands = [
        (x_nodes.astype(jnp.float32), pl.BlockSpec((nc, f_in), row_chunk)),
        (adj, pl.BlockSpec((1, nc, nc), chunk3)),
        (seg_local, pl.BlockSpec((1, 1, nc), chunk3)),
        (drug.astype(jnp.float32), pl.BlockSpec((graphs_per_chunk, drug_dim), row_chunk)),
        _pinned(packed["gcn_w1"]), _pinned(packed["gcn_b1"]),
        _pinned(packed["gcn_w2"]), _pinned(packed["gcn_b2"]),
        _pinned(packed["w_cd1"]), _pinned(packed["b_cd1"]),
        _pinned(packed["w_cd2"]), _pinned(packed["b_cd2"]),
        _pinned(packed["wf1_c"]), _pinned(packed["wf1_d"]), _pinned(packed["bf1"]),
        _pinned(packed["wf2"]), _pinned(packed["bf2"]),
        _pinned(packed["wf3_t"]), _pinned(packed["bf3"]),
    ]
    args = [a for a, _ in operands]
    in_specs = [s for _, s in operands]

    y = pl.pallas_call(
        _graphtab_kernel,
        out_shape=jax.ShapeDtypeStruct((b_total, 1), jnp.float32),
        grid=(num_chunks,),
        in_specs=in_specs,
        # (b_total, 1) output is a tiny masked store; when B grows, emit a
        # lane-dense [num_chunks, G] slab instead and reshape in the wrapper.
        out_specs=pl.BlockSpec((graphs_per_chunk, 1), row_chunk),
        compiler_params=pltpu.CompilerParams(
            dimension_semantics=("parallel",)),   # v7x: one chunk per TensorCore
    )(*args)
    return y.reshape(b_total)


# ---------------------------------------------------------------------------
# Deterministic parameter init (shapes from the module's __init__)
# ---------------------------------------------------------------------------
def _linear(key, fan_in, fan_out):
    kw, kb = jax.random.split(key)
    bound = 1.0 / np.sqrt(fan_in)
    w = jax.random.uniform(kw, (fan_in, fan_out), jnp.float32, -bound, bound)
    b = jax.random.uniform(kb, (1, fan_out), jnp.float32, -bound, bound)
    return w, b


def init_params(key):
    ks = jax.random.split(key, 9)
    p = {}
    p["gcn_w1"], p["gcn_b1"] = _linear(ks[0], 4, 256)      # GCNConv(4, 256)
    p["gcn_w2"], p["gcn_b2"] = _linear(ks[1], 256, 256)    # GCNConv(256, 256)
    p["wc1"], p["bc1"] = _linear(ks[2], 256, 128)          # cell_emb Linear(256,128)
    p["wc2"], p["bc2"] = _linear(ks[3], 128, 128)          # cell_emb Linear(128,128)
    p["wd1"], p["bd1"] = _linear(ks[4], 256, 128)          # drug_nn Linear(256,128)
    p["wd2"], p["bd2"] = _linear(ks[5], 128, 128)          # drug_nn Linear(128,128)
    p["wf1"], p["bf1"] = _linear(ks[6], 256, 128)          # fcn Linear(256,128)
    p["wf2"], p["bf2"] = _linear(ks[7], 128, 64)           # fcn Linear(128,64)
    p["wf3"], p["bf3"] = _linear(ks[8], 64, 1)             # fcn Linear(64,1)
    return p


# ---------------------------------------------------------------------------
# Pure-JAX references
#   reference_mixed: module math under the kernel's precision policy
#                    (bf16 matmul operands, f32 accumulate / elementwise)
#   reference_f32  : strict torch-order f32 math
# ---------------------------------------------------------------------------
def reference_mixed(x_nodes, edge_index, batch, drug, p, num_graphs):
    f32, bf16 = jnp.float32, jnp.bfloat16
    mm = lambda a, b: jnp.dot(a.astype(bf16), b.astype(bf16), preferred_element_type=f32)
    relu = lambda v: jnp.maximum(v, 0.0)
    n = x_nodes.shape[0]
    src, dst = edge_index[0], edge_index[1]
    adj = jnp.zeros((n, n), f32).at[dst, src].add(1.0) + jnp.eye(n, dtype=f32)
    dinv = jax.lax.rsqrt(jnp.sum(adj, axis=1, keepdims=True))
    ax = dinv * mm(adj, dinv * x_nodes)
    h1 = relu(mm(ax, p["gcn_w1"]) + p["gcn_b1"])
    h2 = relu(dinv * mm(adj, dinv * mm(h1, p["gcn_w2"])) + p["gcn_b2"])
    one_hot = (batch[None, :] == jnp.arange(num_graphs)[:, None]).astype(f32)
    counts = jnp.maximum(jnp.sum(one_hot, axis=1, keepdims=True), 1.0)
    pooled = mm(one_hot / counts, h2)
    ce = relu(mm(relu(mm(pooled, p["wc1"]) + p["bc1"]), p["wc2"]) + p["bc2"])
    de = relu(mm(relu(mm(drug, p["wd1"]) + p["bd1"]), p["wd2"]) + p["bd2"])
    h = relu(mm(ce, p["wf1"][0:128]) + mm(de, p["wf1"][128:256]) + p["bf1"])
    h = relu(mm(h, p["wf2"]) + p["bf2"])
    return jnp.sum(h * p["wf3"].T, axis=-1) + p["bf3"][0, 0]


def reference_f32(x_nodes, edge_index, batch, drug, p, num_graphs):
    n = x_nodes.shape[0]
    src, dst = edge_index[0], edge_index[1]
    adj = jnp.zeros((n, n), jnp.float32).at[dst, src].add(1.0) + jnp.eye(n)
    deg = jnp.sum(adj, axis=1)
    dinv = 1.0 / jnp.sqrt(deg)
    adj_hat = adj * dinv[:, None] * dinv[None, :]
    relu = lambda v: jnp.maximum(v, 0.0)
    h1 = relu(adj_hat @ (x_nodes @ p["gcn_w1"]) + p["gcn_b1"])
    h2 = relu(adj_hat @ (h1 @ p["gcn_w2"]) + p["gcn_b2"])
    one_hot = (batch[None, :] == jnp.arange(num_graphs)[:, None]).astype(jnp.float32)
    pooled = (one_hot @ h2) / jnp.maximum(jnp.sum(one_hot, axis=1, keepdims=True), 1.0)
    ce = relu(relu(pooled @ p["wc1"] + p["bc1"]) @ p["wc2"] + p["bc2"])
    de = relu(relu(drug @ p["wd1"] + p["bd1"]) @ p["wd2"] + p["bd2"])
    cat = jnp.concatenate([ce, de], axis=-1)
    h = relu(cat @ p["wf1"] + p["bf1"])
    h = relu(h @ p["wf2"] + p["bf2"])
    y = h @ p["wf3"] + p["bf3"]
    return y.reshape(y.shape[0])


# ---------------------------------------------------------------------------
if __name__ == "__main__":
    NODES_PER_GRAPH = 8
    GRAPHS_PER_CHUNK = 16                         # 128 node rows / chunk -> MXU M filled
    NUM_CHUNKS = 2                                # grid steps ("parallel" -> 1 per TC on v7x)
    NUM_GRAPHS = GRAPHS_PER_CHUNK * NUM_CHUNKS    # 32 graphs
    N = NUM_GRAPHS * NODES_PER_GRAPH              # 256 nodes
    F_IN = 4                                      # GCNConv in_channels
    DRUG_DIM = 256                                # drug_nn input dim

    key = jax.random.PRNGKey(0)
    k_param, k_x, k_drug = jax.random.split(key, 3)
    params = init_params(k_param)
    packed = pack_params(params)

    # Deterministic small graph batch: an undirected ring inside each graph.
    src_list, dst_list = [], []
    for g in range(NUM_GRAPHS):
        base = g * NODES_PER_GRAPH
        for i in range(NODES_PER_GRAPH):
            a = base + i
            c = base + (i + 1) % NODES_PER_GRAPH
            src_list += [a, c]
            dst_list += [c, a]
    edge_index = jnp.asarray(np.stack([src_list, dst_list]), dtype=jnp.int32)   # [2, E]
    batch = jnp.asarray(np.repeat(np.arange(NUM_GRAPHS), NODES_PER_GRAPH),
                        dtype=jnp.int32)                                        # [N]

    x_nodes = jax.random.normal(k_x, (N, F_IN), jnp.float32)                    # cell.x
    drug = jax.random.normal(k_drug, (NUM_GRAPHS, DRUG_DIM), jnp.float32)       # drug

    y_pred = graphtab_forward(x_nodes, edge_index, batch, drug, packed,
                              NUM_GRAPHS, GRAPHS_PER_CHUNK)
    y_pred = jax.block_until_ready(y_pred)
    assert y_pred.shape == (NUM_GRAPHS,)

    # Kernel vs. module math under the same bf16-operand / f32-accumulate policy.
    y_mixed = reference_mixed(x_nodes, edge_index, batch, drug, params, NUM_GRAPHS)
    np.testing.assert_allclose(np.asarray(y_pred), np.asarray(y_mixed),
                               rtol=2e-2, atol=2e-2)
    # Kernel vs. strict f32 torch-order reference (loose tol: bf16 policy).
    y_f32 = reference_f32(x_nodes, edge_index, batch, drug, params, NUM_GRAPHS)
    np.testing.assert_allclose(np.asarray(y_pred), np.asarray(y_f32),
                               rtol=1e-1, atol=1e-1)

    print("KERNEL_OK")
</pallas_src>

<mosaic_0001>
module attributes {stable_mosaic.version = 11 : i64} {
  func.func @_graphtab_kernel(%arg0: i32, %arg1: memref<128x4xf32, #tpu.memory_space<vmem>>, %arg2: memref<1x128x128xbf16, #tpu.memory_space<vmem>>, %arg3: memref<1x1x128xi32, #tpu.memory_space<vmem>>, %arg4: memref<16x256xf32, #tpu.memory_space<vmem>>, %arg5: memref<4x256xbf16, #tpu.memory_space<vmem>>, %arg6: memref<1x256xf32, #tpu.memory_space<vmem>>, %arg7: memref<256x256xbf16, #tpu.memory_space<vmem>>, %arg8: memref<1x256xf32, #tpu.memory_space<vmem>>, %arg9: memref<256x256xbf16, #tpu.memory_space<vmem>>, %arg10: memref<1x256xf32, #tpu.memory_space<vmem>>, %arg11: memref<256x256xbf16, #tpu.memory_space<vmem>>, %arg12: memref<1x256xf32, #tpu.memory_space<vmem>>, %arg13: memref<128x128xbf16, #tpu.memory_space<vmem>>, %arg14: memref<128x128xbf16, #tpu.memory_space<vmem>>, %arg15: memref<1x128xf32, #tpu.memory_space<vmem>>, %arg16: memref<128x64xbf16, #tpu.memory_space<vmem>>, %arg17: memref<1x64xf32, #tpu.memory_space<vmem>>, %arg18: memref<1x64xf32, #tpu.memory_space<vmem>>, %arg19: memref<1x1xf32, #tpu.memory_space<vmem>>, %arg20: memref<16x1xf32, #tpu.memory_space<vmem>>) attributes {dimension_semantics = [#tpu.dimension_semantics<parallel>], iteration_bounds = array<i64: 2>, scalar_prefetch = 0 : i64, scratch_operands = 0 : i64, tpu.core_type = #tpu.core_type<tc>, window_params = [{transform_indices = @transform_0, window_bounds = array<i64: 128, 4>}, {transform_indices = @transform_1, window_bounds = array<i64: 1, 128, 128>}, {transform_indices = @transform_2, window_bounds = array<i64: 1, 1, 128>}, {transform_indices = @transform_3, window_bounds = array<i64: 16, 256>}, {pipeline_mode = #tpu.pipeline_mode<synchronous>, transform_indices = @transform_4, window_bounds = array<i64: 4, 256>}, {pipeline_mode = #tpu.pipeline_mode<synchronous>, transform_indices = @transform_5, window_bounds = array<i64: 1, 256>}, {pipeline_mode = #tpu.pipeline_mode<synchronous>, transform_indices = @transform_6, window_bounds = array<i64: 256, 256>}, {pipeline_mode = #tpu.pipeline_mode<synchronous>, transform_indices = @transform_7, window_bounds = array<i64: 1, 256>}, {pipeline_mode = #tpu.pipeline_mode<synchronous>, transform_indices = @transform_8, window_bounds = array<i64: 256, 256>}, {pipeline_mode = #tpu.pipeline_mode<synchronous>, transform_indices = @transform_9, window_bounds = array<i64: 1, 256>}, {pipeline_mode = #tpu.pipeline_mode<synchronous>, transform_indices = @transform_10, window_bounds = array<i64: 256, 256>}, {pipeline_mode = #tpu.pipeline_mode<synchronous>, transform_indices = @transform_11, window_bounds = array<i64: 1, 256>}, {pipeline_mode = #tpu.pipeline_mode<synchronous>, transform_indices = @transform_12, window_bounds = array<i64: 128, 128>}, {pipeline_mode = #tpu.pipeline_mode<synchronous>, transform_indices = @transform_13, window_bounds = array<i64: 128, 128>}, {pipeline_mode = #tpu.pipeline_mode<synchronous>, transform_indices = @transform_14, window_bounds = array<i64: 1, 128>}, {pipeline_mode = #tpu.pipeline_mode<synchronous>, transform_indices = @transform_15, window_bounds = array<i64: 128, 64>}, {pipeline_mode = #tpu.pipeline_mode<synchronous>, transform_indices = @transform_16, window_bounds = array<i64: 1, 64>}, {pipeline_mode = #tpu.pipeline_mode<synchronous>, transform_indices = @transform_17, window_bounds = array<i64: 1, 64>}, {pipeline_mode = #tpu.pipeline_mode<synchronous>, transform_indices = @transform_18, window_bounds = array<i64: 1, 1>}, {transform_indices = @transform_19, window_bounds = array<i64: 16, 1>}]} {
    %c0 = arith.constant 0 : index
    %c0_0 = arith.constant 0 : index
    %c0_1 = arith.constant 0 : index
    %0 = vector.load %arg2[%c0, %c0_0, %c0_1] : memref<1x128x128xbf16, #tpu.memory_space<vmem>>, vector<1x128x128xbf16>
    %1 = vector.shape_cast %0 : vector<1x128x128xbf16> to vector<128x128xbf16>
    %2 = arith.extf %1 : vector<128x128xbf16> to vector<128x128xf32>
    %cst = arith.constant dense<0.000000e+00> : vector<128xf32>
    %3 = vector.multi_reduction <add>, %2, %cst [1] : vector<128x128xf32> to vector<128xf32>
    %4 = vector.shape_cast %3 : vector<128xf32> to vector<128x1xf32>
    %5 = math.rsqrt %4 : vector<128x1xf32>
    %c0_2 = arith.constant 0 : index
    %c0_3 = arith.constant 0 : index
    %6 = vector.load %arg1[%c0_2, %c0_3] : memref<128x4xf32, #tpu.memory_space<vmem>>, vector<128x4xf32>
    %7 = vector.broadcast %5 : vector<128x1xf32> to vector<128x4xf32>
    %8 = arith.mulf %7, %6 : vector<128x4xf32>
    %9 = arith.truncf %8 : vector<128x4xf32> to vector<128x4xbf16>
    %cst_4 = arith.constant dense<0.000000e+00> : vector<128x4xf32>
    %10 = tpu.matmul %1, %9, %cst_4 {dimension_numbers = #tpu.dot_dimension_numbers<[1], [0], [0], [1], [0, 0, 1, 1], [], []>} : vector<128x128xbf16>, vector<128x4xbf16>, vector<128x4xf32> -> vector<128x4xf32>
    %11 = vector.broadcast %5 : vector<128x1xf32> to vector<128x4xf32>
    %12 = arith.mulf %11, %10 : vector<128x4xf32>
    %13 = arith.truncf %12 : vector<128x4xf32> to vector<128x4xbf16>
    %c0_5 = arith.constant 0 : index
    %c0_6 = arith.constant 0 : index
    %14 = vector.load %arg5[%c0_5, %c0_6] : memref<4x256xbf16, #tpu.memory_space<vmem>>, vector<4x256xbf16>
    %cst_7 = arith.constant dense<0.000000e+00> : vector<128x256xf32>
    %15 = tpu.matmul %13, %14, %cst_7 {dimension_numbers = #tpu.dot_dimension_numbers<[1], [0], [0], [1], [0, 0, 1, 1], [], []>} : vector<128x4xbf16>, vector<4x256xbf16>, vector<128x256xf32> -> vector<128x256xf32>
    %c0_8 = arith.constant 0 : index
    %c0_9 = arith.constant 0 : index
    %16 = vector.load %arg6[%c0_8, %c0_9] : memref<1x256xf32, #tpu.memory_space<vmem>>, vector<1x256xf32>
    %17 = vector.broadcast %16 : vector<1x256xf32> to vector<128x256xf32>
    %18 = arith.addf %15, %17 : vector<128x256xf32>
    %cst_10 = arith.constant 0.000000e+00 : f32
    %19 = vector.broadcast %cst_10 : f32 to vector<128x256xf32>
    %20 = arith.maximumf %18, %19 : vector<128x256xf32>
    %21 = arith.truncf %20 : vector<128x256xf32> to vector<128x256xbf16>
    %c0_11 = arith.constant 0 : index
    %c0_12 = arith.constant 0 : index
    %22 = vector.load %arg7[%c0_11, %c0_12] : memref<256x256xbf16, #tpu.memory_space<vmem>>, vector<256x256xbf16>
    %cst_13 = arith.constant dense<0.000000e+00> : vector<128x256xf32>
    %23 = tpu.matmul %21, %22, %cst_13 {dimension_numbers = #tpu.dot_dimension_numbers<[1], [0], [0], [1], [0, 0, 1, 1], [], []>} : vector<128x256xbf16>, vector<256x256xbf16>, vector<128x256xf32> -> vector<128x256xf32>
    %24 = vector.broadcast %5 : vector<128x1xf32> to vector<128x256xf32>
    %25 = arith.mulf %24, %23 : vector<128x256xf32>
    %26 = arith.truncf %25 : vector<128x256xf32> to vector<128x256xbf16>
    %cst_14 = arith.constant dense<0.000000e+00> : vector<128x256xf32>
    %27 = tpu.matmul %1, %26, %cst_14 {dimension_numbers = #tpu.dot_dimension_numbers<[1], [0], [0], [1], [0, 0, 1, 1], [], []>} : vector<128x128xbf16>, vector<128x256xbf16>, vector<128x256xf32> -> vector<128x256xf32>
    %28 = vector.broadcast %5 : vector<128x1xf32> to vector<128x256xf32>
    %29 = arith.mulf %28, %27 : vector<128x256xf32>
    %c0_15 = arith.constant 0 : index
    %c0_16 = arith.constant 0 : index
    %30 = vector.load %arg8[%c0_15, %c0_16] : memref<1x256xf32, #tpu.memory_space<vmem>>, vector<1x256xf32>
    %31 = vector.broadcast %30 : vector<1x256xf32> to vector<128x256xf32>
    %32 = arith.addf %29, %31 : vector<128x256xf32>
    %cst_17 = arith.constant 0.000000e+00 : f32
    %33 = vector.broadcast %cst_17 : f32 to vector<128x256xf32>
    %34 = arith.maximumf %32, %33 : vector<128x256xf32>
    %c0_18 = arith.constant 0 : index
    %c0_19 = arith.constant 0 : index
    %c0_20 = arith.constant 0 : index
    %35 = vector.load %arg3[%c0_18, %c0_19, %c0_20] : memref<1x1x128xi32, #tpu.memory_space<vmem>>, vector<1x1x128xi32>
    %36 = vector.shape_cast %35 : vector<1x1x128xi32> to vector<1x128xi32>
    %37 = tpu.iota {dimensions = array<i32: 0>} : vector<16x128xi32>
    %38 = vector.broadcast %36 : vector<1x128xi32> to vector<16x128xi32>
    %39 = arith.cmpi eq, %37, %38 : vector<16x128xi32>
    %40 = arith.extui %39 : vector<16x128xi1> to vector<16x128xi32>
    %41 = arith.sitofp %40 : vector<16x128xi32> to vector<16x128xf32>
    %cst_21 = arith.constant dense<0.000000e+00> : vector<16xf32>
    %42 = vector.multi_reduction <add>, %41, %cst_21 [1] : vector<16x128xf32> to vector<16xf32>
    %43 = vector.shape_cast %42 : vector<16xf32> to vector<16x1xf32>
    %cst_22 = arith.constant 1.000000e+00 : f32
    %44 = vector.broadcast %cst_22 : f32 to vector<16x1xf32>
    %45 = arith.maximumf %43, %44 : vector<16x1xf32>
    %46 = vector.broadcast %45 : vector<16x1xf32> to vector<16x128xf32>
    %47 = arith.divf %41, %46 : vector<16x128xf32>
    %48 = arith.truncf %47 : vector<16x128xf32> to vector<16x128xbf16>
    %49 = arith.truncf %34 : vector<128x256xf32> to vector<128x256xbf16>
    %cst_23 = arith.constant dense<0.000000e+00> : vector<16x256xf32>
    %50 = tpu.matmul %48, %49, %cst_23 {dimension_numbers = #tpu.dot_dimension_numbers<[1], [0], [0], [1], [0, 0, 1, 1], [], []>} : vector<16x128xbf16>, vector<128x256xbf16>, vector<16x256xf32> -> vector<16x256xf32>
    %c0_24 = arith.constant 0 : index
    %c0_25 = arith.constant 0 : index
    %51 = vector.load %arg4[%c0_24, %c0_25] : memref<16x256xf32, #tpu.memory_space<vmem>>, vector<16x256xf32>
    %52 = tpu.concatenate %50, %51 in 0 : vector<16x256xf32>, vector<16x256xf32> -> vector<32x256xf32>
    %53 = arith.truncf %52 : vector<32x256xf32> to vector<32x256xbf16>
    %c0_26 = arith.constant 0 : index
    %c0_27 = arith.constant 0 : index
    %54 = vector.load %arg9[%c0_26, %c0_27] : memref<256x256xbf16, #tpu.memory_space<vmem>>, vector<256x256xbf16>
    %cst_28 = arith.constant dense<0.000000e+00> : vector<32x256xf32>
    %55 = tpu.matmul %53, %54, %cst_28 {dimension_numbers = #tpu.dot_dimension_numbers<[1], [0], [0], [1], [0, 0, 1, 1], [], []>} : vector<32x256xbf16>, vector<256x256xbf16>, vector<32x256xf32> -> vector<32x256xf32>
    %c0_29 = arith.constant 0 : index
    %c0_30 = arith.constant 0 : index
    %56 = vector.load %arg10[%c0_29, %c0_30] : memref<1x256xf32, #tpu.memory_space<vmem>>, vector<1x256xf32>
    %57 = vector.broadcast %56 : vector<1x256xf32> to vector<32x256xf32>
    %58 = arith.addf %55, %57 : vector<32x256xf32>
    %cst_31 = arith.constant 0.000000e+00 : f32
    %59 = vector.broadcast %cst_31 : f32 to vector<32x256xf32>
    %60 = arith.maximumf %58, %59 : vector<32x256xf32>
    %61 = arith.truncf %60 : vector<32x256xf32> to vector<32x256xbf16>
    %c0_32 = arith.constant 0 : index
    %c0_33 = arith.constant 0 : index
    %62 = vector.load %arg11[%c0_32, %c0_33] : memref<256x256xbf16, #tpu.memory_space<vmem>>, vector<256x256xbf16>
    %cst_34 = arith.constant dense<0.000000e+00> : vector<32x256xf32>
    %63 = tpu.matmul %61, %62, %cst_34 {dimension_numbers = #tpu.dot_dimension_numbers<[1], [0], [0], [1], [0, 0, 1, 1], [], []>} : vector<32x256xbf16>, vector<256x256xbf16>, vector<32x256xf32> -> vector<32x256xf32>
    %c0_35 = arith.constant 0 : index
    %c0_36 = arith.constant 0 : index
    %64 = vector.load %arg12[%c0_35, %c0_36] : memref<1x256xf32, #tpu.memory_space<vmem>>, vector<1x256xf32>
    %65 = vector.broadcast %64 : vector<1x256xf32> to vector<32x256xf32>
    %66 = arith.addf %63, %65 : vector<32x256xf32>
    %cst_37 = arith.constant 0.000000e+00 : f32
    %67 = vector.broadcast %cst_37 : f32 to vector<32x256xf32>
    %68 = arith.maximumf %66, %67 : vector<32x256xf32>
    %69 = vector.extract_strided_slice %68 {offsets = [0, 0], sizes = [16, 128], strides = [1, 1]} : vector<32x256xf32> to vector<16x128xf32>
    %70 = vector.extract_strided_slice %68 {offsets = [16, 128], sizes = [16, 128], strides = [1, 1]} : vector<32x256xf32> to vector<16x128xf32>
    %71 = arith.truncf %69 : vector<16x128xf32> to vector<16x128xbf16>
    %c0_38 = arith.constant 0 : index
    %c0_39 = arith.constant 0 : index
    %72 = vector.load %arg13[%c0_38, %c0_39] : memref<128x128xbf16, #tpu.memory_space<vmem>>, vector<128x128xbf16>
    %cst_40 = arith.constant dense<0.000000e+00> : vector<16x128xf32>
    %73 = tpu.matmul %71, %72, %cst_40 {dimension_numbers = #tpu.dot_dimension_numbers<[1], [0], [0], [1], [0, 0, 1, 1], [], []>} : vector<16x128xbf16>, vector<128x128xbf16>, vector<16x128xf32> -> vector<16x128xf32>
    %74 = arith.truncf %70 : vector<16x128xf32> to vector<16x128xbf16>
    %c0_41 = arith.constant 0 : index
    %c0_42 = arith.constant 0 : index
    %75 = vector.load %arg14[%c0_41, %c0_42] : memref<128x128xbf16, #tpu.memory_space<vmem>>, vector<128x128xbf16>
    %cst_43 = arith.constant dense<0.000000e+00> : vector<16x128xf32>
    %76 = tpu.matmul %74, %75, %cst_43 {dimension_numbers = #tpu.dot_dimension_numbers<[1], [0], [0], [1], [0, 0, 1, 1], [], []>} : vector<16x128xbf16>, vector<128x128xbf16>, vector<16x128xf32> -> vector<16x128xf32>
    %77 = arith.addf %73, %76 : vector<16x128xf32>
    %c0_44 = arith.constant 0 : index
    %c0_45 = arith.constant 0 : index
    %78 = vector.load %arg15[%c0_44, %c0_45] : memref<1x128xf32, #tpu.memory_space<vmem>>, vector<1x128xf32>
    %79 = vector.broadcast %78 : vector<1x128xf32> to vector<16x128xf32>
    %80 = arith.addf %77, %79 : vector<16x128xf32>
    %cst_46 = arith.constant 0.000000e+00 : f32
    %81 = vector.broadcast %cst_46 : f32 to vector<16x128xf32>
    %82 = arith.maximumf %80, %81 : vector<16x128xf32>
    %83 = arith.truncf %82 : vector<16x128xf32> to vector<16x128xbf16>
    %c0_47 = arith.constant 0 : index
    %c0_48 = arith.constant 0 : index
    %84 = vector.load %arg16[%c0_47, %c0_48] : memref<128x64xbf16, #tpu.memory_space<vmem>>, vector<128x64xbf16>
    %cst_49 = arith.constant dense<0.000000e+00> : vector<16x64xf32>
    %85 = tpu.matmul %83, %84, %cst_49 {dimension_numbers = #tpu.dot_dimension_numbers<[1], [0], [0], [1], [0, 0, 1, 1], [], []>} : vector<16x128xbf16>, vector<128x64xbf16>, vector<16x64xf32> -> vector<16x64xf32>
    %c0_50 = arith.constant 0 : index
    %c0_51 = arith.constant 0 : index
    %86 = vector.load %arg17[%c0_50, %c0_51] : memref<1x64xf32, #tpu.memory_space<vmem>>, vector<1x64xf32>
    %87 = vector.broadcast %86 : vector<1x64xf32> to vector<16x64xf32>
    %88 = arith.addf %85, %87 : vector<16x64xf32>
    %cst_52 = arith.constant 0.000000e+00 : f32
    %89 = vector.broadcast %cst_52 : f32 to vector<16x64xf32>
    %90 = arith.maximumf %88, %89 : vector<16x64xf32>
    %c0_53 = arith.constant 0 : index
    %c0_54 = arith.constant 0 : index
    %91 = vector.load %arg18[%c0_53, %c0_54] : memref<1x64xf32, #tpu.memory_space<vmem>>, vector<1x64xf32>
    %92 = vector.broadcast %91 : vector<1x64xf32> to vector<16x64xf32>
    %93 = arith.mulf %90, %92 : vector<16x64xf32>
    %cst_55 = arith.constant dense<0.000000e+00> : vector<16xf32>
    %94 = vector.multi_reduction <add>, %93, %cst_55 [1] : vector<16x64xf32> to vector<16xf32>
    %95 = vector.shape_cast %94 : vector<16xf32> to vector<16x1xf32>
    %c0_56 = arith.constant 0 : index
    %c0_57 = arith.constant 0 : index
    %96 = vector.load %arg19[%c0_56, %c0_57] : memref<1x1xf32, #tpu.memory_space<vmem>>, vector<1x1xf32>
    %97 = vector.broadcast %96 : vector<1x1xf32> to vector<16x1xf32>
    %98 = arith.addf %95, %97 : vector<16x1xf32>
    %c0_58 = arith.constant 0 : index
    %c0_59 = arith.constant 0 : index
    %99 = vector.load %arg20[%c0_58, %c0_59] : memref<16x1xf32, #tpu.memory_space<vmem>>, vector<16x1xf32>
    tpu.vector_store %arg20[%c0_58, %c0_59], %98 {strides = array<i32>} : memref<16x1xf32, #tpu.memory_space<vmem>>, vector<16x1xf32>,
    return
  }
  func.func @transform_0(%arg0: i32) -> (i32, i32) {
    %c0_i32 = arith.constant 0 : i32
    %c0_i32_0 = arith.constant 0 : i32
    return %arg0, %c0_i32 : i32, i32
  }
  func.func @transform_1(%arg0: i32) -> (i32, i32, i32) {
    %c0_i32 = arith.constant 0 : i32
    %c0_i32_0 = arith.constant 0 : i32
    %c0_i32_1 = arith.constant 0 : i32
    return %arg0, %c0_i32, %c0_i32_0 : i32, i32, i32
  }
  func.func @transform_2(%arg0: i32) -> (i32, i32, i32) {
    %c0_i32 = arith.constant 0 : i32
    %c0_i32_0 = arith.constant 0 : i32
    %c0_i32_1 = arith.constant 0 : i32
    return %arg0, %c0_i32, %c0_i32_0 : i32, i32, i32
  }
  func.func @transform_3(%arg0: i32) -> (i32, i32) {
    %c0_i32 = arith.constant 0 : i32
    %c0_i32_0 = arith.constant 0 : i32
    return %arg0, %c0_i32 : i32, i32
  }
  func.func @transform_4(%arg0: i32) -> (i32, i32) {
    %c0_i32 = arith.constant 0 : i32
    %c0_i32_0 = arith.constant 0 : i32
    %c0_i32_1 = arith.constant 0 : i32
    return %c0_i32, %c0_i32_0 : i32, i32
  }
  func.func @transform_5(%arg0: i32) -> (i32, i32) {
    %c0_i32 = arith.constant 0 : i32
    %c0_i32_0 = arith.constant 0 : i32
    %c0_i32_1 = arith.constant 0 : i32
    return %c0_i32, %c0_i32_0 : i32, i32
  }
  func.func @transform_6(%arg0: i32) -> (i32, i32) {
    %c0_i32 = arith.constant 0 : i32
    %c0_i32_0 = arith.constant 0 : i32
    %c0_i32_1 = arith.constant 0 : i32
    return %c0_i32, %c0_i32_0 : i32, i32
  }
  func.func @transform_7(%arg0: i32) -> (i32, i32) {
    %c0_i32 = arith.constant 0 : i32
    %c0_i32_0 = arith.constant 0 : i32
    %c0_i32_1 = arith.constant 0 : i32
    return %c0_i32, %c0_i32_0 : i32, i32
  }
  func.func @transform_8(%arg0: i32) -> (i32, i32) {
    %c0_i32 = arith.constant 0 : i32
    %c0_i32_0 = arith.constant 0 : i32
    %c0_i32_1 = arith.constant 0 : i32
    return %c0_i32, %c0_i32_0 : i32, i32
  }
  func.func @transform_9(%arg0: i32) -> (i32, i32) {
    %c0_i32 = arith.constant 0 : i32
    %c0_i32_0 = arith.constant 0 : i32
    %c0_i32_1 = arith.constant 0 : i32
    return %c0_i32, %c0_i32_0 : i32, i32
  }
  func.func @transform_10(%arg0: i32) -> (i32, i32) {
    %c0_i32 = arith.constant 0 : i32
    %c0_i32_0 = arith.constant 0 : i32
    %c0_i32_1 = arith.constant 0 : i32
    return %c0_i32, %c0_i32_0 : i32, i32
  }
  func.func @transform_11(%arg0: i32) -> (i32, i32) {
    %c0_i32 = arith.constant 0 : i32
    %c0_i32_0 = arith.constant 0 : i32
    %c0_i32_1 = arith.constant 0 : i32
    return %c0_i32, %c0_i32_0 : i32, i32
  }
  func.func @transform_12(%arg0: i32) -> (i32, i32) {
    %c0_i32 = arith.constant 0 : i32
    %c0_i32_0 = arith.constant 0 : i32
    %c0_i32_1 = arith.constant 0 : i32
    return %c0_i32, %c0_i32_0 : i32, i32
  }
  func.func @transform_13(%arg0: i32) -> (i32, i32) {
    %c0_i32 = arith.constant 0 : i32
    %c0_i32_0 = arith.constant 0 : i32
    %c0_i32_1 = arith.constant 0 : i32
    return %c0_i32, %c0_i32_0 : i32, i32
  }
  func.func @transform_14(%arg0: i32) -> (i32, i32) {
    %c0_i32 = arith.constant 0 : i32
    %c0_i32_0 = arith.constant 0 : i32
    %c0_i32_1 = arith.constant 0 : i32
    return %c0_i32, %c0_i32_0 : i32, i32
  }
  func.func @transform_15(%arg0: i32) -> (i32, i32) {
    %c0_i32 = arith.constant 0 : i32
    %c0_i32_0 = arith.constant 0 : i32
    %c0_i32_1 = arith.constant 0 : i32
    return %c0_i32, %c0_i32_0 : i32, i32
  }
  func.func @transform_16(%arg0: i32) -> (i32, i32) {
    %c0_i32 = arith.constant 0 : i32
    %c0_i32_0 = arith.constant 0 : i32
    %c0_i32_1 = arith.constant 0 : i32
    return %c0_i32, %c0_i32_0 : i32, i32
  }
  func.func @transform_17(%arg0: i32) -> (i32, i32) {
    %c0_i32 = arith.constant 0 : i32
    %c0_i32_0 = arith.constant 0 : i32
    %c0_i32_1 = arith.constant 0 : i32
    return %c0_i32, %c0_i32_0 : i32, i32
  }
  func.func @transform_18(%arg0: i32) -> (i32, i32) {
    %c0_i32 = arith.constant 0 : i32
    %c0_i32_0 = arith.constant 0 : i32
    %c0_i32_1 = arith.constant 0 : i32
    return %c0_i32, %c0_i32_0 : i32, i32
  }
  func.func @transform_19(%arg0: i32) -> (i32, i32) {
    %c0_i32 = arith.constant 0 : i32
    %c0_i32_0 = arith.constant 0 : i32
    return %arg0, %c0_i32 : i32, i32
  }
}

</mosaic_0001>

<bundles_post_ra>
// kernel: tpu_custom_call.1
= control target key start
LH: loop header
LB: loop body
LE: loop exit
PB: predicated region body
PF: predicated region fallthrough
CT: control target
= control target key end

     0   :  { %s5187_s0 = inlined_call_operand.vmem [shape: f32[256,4], index: 0, kind: input, shape index: {}]   ;;  %s5188_s1 = inlined_call_operand.hbm [shape: bf16[2,128,128], index: 1, kind: input, shape index: {}]   ;;  %s5189_s2 = inlined_call_operand.vmem [shape: s32[2,1,128], index: 2, kind: input, shape index: {}]   ;;  %s5190_s3 = inlined_call_operand.vmem [shape: f32[32,256], index: 3, kind: input, shape index: {}]   ;;  %s5191_s4 = inlined_call_operand.vmem [shape: bf16[4,256], index: 4, kind: input, shape index: {}]   ;;  %s5192_s5 = inlined_call_operand.vmem [shape: f32[1,256], index: 5, kind: input, shape index: {}]   ;;  %s5193_s6 = inlined_call_operand.vmem [shape: bf16[256,256], index: 6, kind: input, shape index: {}]   ;;  %s5194_s7 = inlined_call_operand.vmem [shape: f32[1,256], index: 7, kind: input, shape index: {}]   ;;  %s5195_s8 = inlined_call_operand.hbm [shape: bf16[256,256], index: 8, kind: input, shape index: {}]   ;;  %s5196_s9 = inlined_call_operand.vmem [shape: f32[1,256], index: 9, kind: input, shape index: {}]   ;;  %s5197_s10 = inlined_call_operand.hbm [shape: bf16[256,256], index: 10, kind: input, shape index: {}]   ;;  %s5198_s11 = inlined_call_operand.vmem [shape: f32[1,256], index: 11, kind: input, shape index: {}]   ;;  %s5199_s12 = inlined_call_operand.hbm [shape: bf16[128,128], index: 12, kind: input, shape index: {}]   ;;  %s5200_s13 = inlined_call_operand.hbm [shape: bf16[128,128], index: 13, kind: input, shape index: {}]   ;;  %s5201_s14 = inlined_call_operand.vmem [shape: f32[1,128], index: 14, kind: input, shape index: {}]   ;;  %s5202_s15 = inlined_call_operand.vmem [shape: bf16[128,64], index: 15, kind: input, shape index: {}]   ;;  %s5203_s16 = inlined_call_operand.vmem [shape: f32[1,64], index: 16, kind: input, shape index: {}]   ;;  %s5204_s17 = inlined_call_operand.vmem [shape: f32[1,64], index: 17, kind: input, shape index: {}]   ;;  %s5205_s18 = inlined_call_operand.<no memory space> [shape: f32[1,1], index: 18, kind: input, shape index: {}]   ;;  %s5206_s19 = inlined_call_operand.vmem [shape: f32[32,1], index: 19, kind: output, shape index: {}]  }
   0x1   :  { %5222 = sst [smem:[#allocation30_spill]] %s5187_s0  ;;  %v24_v0 = vstv %s5205_s18 }
   0x2   :  { %5223 = sst [smem:[#allocation31_spill]] %s5188_s1  ;;  %25 = vst [vmem:[#allocation2] sm:$0x1] %v24_v0 }
   0x3   :  { %5224 = sst [smem:[#allocation32_spill]] %s5189_s2 }
   0x4   :  { %5225 = sst [smem:[#allocation33_spill]] %s5190_s3 }
   0x5   :  { %5226 = sst [smem:[#allocation34_spill]] %s5195_s8 }
   0x6   :  { %5227 = sst [smem:[#allocation35_spill]] %s5197_s10 }
   0x7   :  { %5228 = sst [smem:[#allocation36_spill]] %s5199_s12 }
   0x8   :  { %5229 = sst [smem:[#allocation37_spill]] %s5203_s16 }
   0x9   :  { %5230 = sst [smem:[#allocation38_spill]] %s5204_s17 }
   0xa   :  { %5231 = sst [smem:[#allocation39_spill]] %s5206_s19 }
   0xb   :  { %26 = vsyncpa [#allocation4], 0 }
   0xc   :  { %28 = vsyncpa [#allocation4 + $0x1], 0 }
   0xd   :  { %29 = vsyncpa [#allocation6], 0 }
   0xe   :  { %30 = vsyncpa [#allocation9], 0  ;;  %s4157_s20 = smov 0   ;;  %s4159_s21 = smov 0  }
   0xf   :  { %s4161_s1 = smov 0   ;;  %s4163_s22 = smov 0  }
  0x10 LB: > { %s4176_s18 = sadd.s32 4294967295, %s4043_s22   ;;  %p82_p0 = scmp.ne.s32.totalorder %s4035_s21, %s4031_s20  ;;  %s4043_s22 = sphi %s4163_s22, %s5289_s22   ;;  %s4039_s1 = sphi %s4161_s1, %s5288_s1   ;;  %s4035_s21 = sphi %s4159_s21, %s5287_s21   ;;  %s4031_s20 = sphi %s4157_s20, %s5286_s20  }
  0x11   : > { %p83_p1 = scmp.eq.s32.totalorder %s4176_s18, 0  ;;  %p3033_p2 = scmp.ge.s32.totalorder %s4043_s22, 1 }
  0x12   : > { %p486_p3 = scmp.lt.s32.totalorder %s4043_s22, 3  ;;  %s5233_s8 = sld [smem:[#allocation34_spill]] }
  0x13   : > { %p4184_p4 = por %p83_p1, %p82_p0  ;;  %s4045_s26 = smov [#allocation5]  }
  0x14   : > { %p4191_p5 = pnand %p3033_p2, %p486_p3  ;;  %s511_s27 = sshll.u32 %s4045_s26, 4  ;;  %s512_s27 = int_to_ptr.vmem [resolvable:$true] %s511_s27 }
  0x15   : > { %s5236_s12 = sld [smem:[#allocation36_spill]]  ;;  %s4046_s20 = smov 128  }
  0x16   : > { %p3735_p6 = pneg %p4191_p5  ;;  %s4047_s23 = smov 8  }
  0x17   : > { %s4048_s24 = smov [#allocation8]   ;;  %s5209_s19 = smov 4  }
  0x18   : > { %s509_s25 = sshll.u32 %s5233_s8, 4  ;;  %p4199_p7 = pnand %p3735_p6, %p83_p1  ;;  %s510_s25 = int_to_ptr.hbm [resolvable:$true] %s509_s25 }
  0x19   : > { %s545_s26 = sshll.u32 %s4048_s24, 4  ;;  %s5208_s8 = smov 64   ;;  %s546_s26 = int_to_ptr.vmem [resolvable:$true] %s545_s26 }
  0x1a   : > { %3738 = dma.hbm_to_vmem [thread:$0]  (!%p4199_p7), %s510_s25, 4096, %s512_s27, [#allocation6], %s4046_s20, %s4046_s20, %s4047_s23  }
  0x1b   : > { %s543_s30 = sshll.u32 %s5236_s12, 4  ;;  %s5237_s10 = sld [smem:[#allocation35_spill]]  ;;  %s544_s30 = int_to_ptr.hbm [resolvable:$true] %s543_s30 }
  0x1c   : > { %3744 = dma.hbm_to_vmem [thread:$0]  (!%p4199_p7), %s544_s30, 1024, %s546_s26, [#allocation9], %s5208_s8, %s5208_s8, %s5209_s19  }
  0x1d   : > { %s4051_s27 = smov [#allocation7]   ;;  %s557_s16 = sshll.u32 %s5200_s13, 4  ;;  %s558_s16 = int_to_ptr.hbm [resolvable:$true] %s557_s16 }
  0x1e   : > { %s528_s24 = sshll.u32 %s4051_s27, 4  ;;  %s4052_s30 = smov [#allocation10]   ;;  %s529_s24 = int_to_ptr.vmem [resolvable:$true] %s528_s24 }
  0x1f   : > { %s559_s26 = sshll.u32 %s4052_s30, 4  ;;  %s4227_s29 = sadd.s32 1, %s4043_s22   ;;  %s560_s26 = int_to_ptr.vmem [resolvable:$true] %s559_s26 }
  0x20   : > { %3747 = dma.hbm_to_vmem [thread:$0]  (!%p4199_p7), %s558_s16, 1024, %s560_s26, [#allocation9], %s5208_s8, %s5208_s8, %s5209_s19  }
  0x21   : > { %s526_s25 = sshll.u32 %s5237_s10, 4  ;;  %s69_s0 = sadd.s32 1, %s4039_s1  ;;  %s527_s25 = int_to_ptr.hbm [resolvable:$true] %s526_s25 }
  0x22   : > { %3741 = dma.hbm_to_vmem [thread:$0]  (!%p4199_p7), %s527_s25, 4096, %s529_s24, [#allocation6], %s4046_s20, %s4046_s20, %s4047_s23  }
  0x23   : > { %s66_s27 = ssub.s32 %s4043_s22, %s4227_s29  ;;  %p76_p8 = scmp.ne.s32.totalorder %s4039_s1, %s4035_s21 }
  0x24   : > { %p67_p9 = scmp.eq.s32.totalorder %s66_s27, 0  ;;  %p77_p10 = scmp.eq.s32.totalorder %s4043_s22, 0 }
  0x25   : > { %s597_s12 = sand.u32 1, %s4039_s1   ;;  %p3756_p12 = scmp.lt.s32.totalorder %s4043_s22, 2 }
  0x26   : > { %s4237_s17 = scalar_select %p67_p9, %s4039_s1, %s69_s0  }
  0x27   : > { %p78_p11 = por %p77_p10, %p76_p8  ;;  %s3039_s20 = sshll.u32 %s597_s12, 6 }
  0x28   : > { %s3587_s23 = sshll.u32 %s4043_s22, 6  ;;  %s5238_s24 = sld [smem:[#allocation31_spill]] }
  0x29   : > { %s601_s26 = scalar_lea.vmem [#allocation3], %s3039_s20  ;;  %p4244_p13 = pnand %p3756_p12, %p78_p11 }
  0x2a   : > { %s609_s8 = sshll.u32 %s601_s26, 4  ;;  %s598_s0 = scalar_lea.sflag [#allocation4], %s597_s12  ;;  %s610_s8 = int_to_ptr.vmem [resolvable:$true] %s609_s8 }
  0x2b   : > { %p3975_p2 = pneg %p4244_p13 }
  0x2e   : > { %s606_s30 = scalar_lea.hbm %s5238_s24, %s3587_s23  ;;  %s3978_s20 = scalar_lea.hbm %s5238_s24, 128 }
  0x2f   : > { %s607_s16 = sshll.u32 %s606_s30, 4  ;;  %s608_s16 = int_to_ptr.hbm [resolvable:$true] %s607_s16 }
  0x30   : > { %s3971_s27 = sshra.s32 %s608_s16, 4  ;;  %s3972_s27 = int_to_ptr.hbm [resolvable:$true] %s3971_s27 }
  0x31   : > { %s3973_s10 = scalar_lea.hbm %s3972_s27, 64  ;;  %p3979_p7 = scmp.lt.s32.totalorder %s3972_s27, %s5238_s24 }
  0x32   : > { %p3974_p0 = scmp.ne.s32.totalorder %s3972_s27, %s3973_s10  ;;  %p3980_p8 = scmp.lt.s32.totalorder %s3978_s20, %s3973_s10 }
  0x34   : > { %p3976_p3 = pnand %p3975_p2, %p3974_p0  ;;  %p3981_p9 = por %p3980_p8, %p3979_p7 }
  0x36   : > { %p3977_p6 = pneg %p3976_p3 }
  0x38   : > { %p3982_p10 = pnand %p3981_p9, %p3977_p6 }
  0x3a   : > { %3985 = shalt.err (!%p3982_p10)
}
  0x3b   : > { %s5240_s12 = smov 4   ;;  %s5241_s30 = smov 64  }
  0x3c   : > { %3751 = dma.hbm_to_vmem [thread:$0]  (!%p4244_p13), %s608_s16, 1024, %s610_s8, %s598_s0, %s5241_s30, %s5241_s30, %s5240_s12  }
  0x3d   : > { %637 = sbr.rel (%p4191_p5) target bundleno = 2002 (0x7d2), region = 96 }
  0x42   : > { %s639_s26 = sand.u32 1, %s4035_s21  }
  0x43   : > { %s3043_s22 = sshll.u32 %s639_s26, 6  ;;  %s640_s23 = scalar_lea.sflag [#allocation4], %s639_s26 }
  0x44   : > { %s4264_s28 = scalar_lea.vmem [#allocation3], %s3043_s22 }
  0x45   : > { %4018 = dma.done.wait (%p4184_p4), %s640_s23, 1024  }
  0x46   : > { %4020 = vsyncadd (%p4184_p4), %s640_s23, 4294966272 }
  0x47   : > { %4022 = dma.done.wait (%p83_p1), [#allocation6], 8192  }
  0x48   : > { %4024 = vsyncadd (%p83_p1), [#allocation6], 4294959104 }
  0x49   : > { %4026 = dma.done.wait (%p83_p1), [#allocation9], 2048  }
  0x4a   : > { %4028 = vsyncadd (%p83_p1), [#allocation9], 4294965248  ;;  %v770_v1 = vld [vmem:[%s4264_s28 + $0x38] sm:$0xff]   ;;  %v768_v2 = vld [vmem:[%s4264_s28 + $0x30] sm:$0xff]   ;;  %s3048_s8 = sshll.u32 %s4176_s18, 4  ;;  %s5242_s3 = sld [smem:[#allocation30_spill]] }
  0x4b   : > { %v766_v3 = vld [vmem:[%s4264_s28 + $0x28] sm:$0xff]   ;;  %v786_v4 = vunpack.c.l.bf16 %v770_v1  ;;  %v784_v5 = vunpack.c.l.bf16 %v768_v2  ;;  %v787_v7 = vunpack.c.h.bf16 %v770_v1  ;;  %v785_v8 = vunpack.c.h.bf16 %v768_v2  ;;  %v765_v10 = vld [vmem:[%s4264_s28 + $0x20] sm:$0xff]   ;;  %v762_v11 = vld [vmem:[%s4264_s28 + $0x18] sm:$0xff]   ;;  %p734_p1 = scmp.lt.s32.totalorder %s3048_s8, 31  ;;  %p739_p4 = scmp.lt.s32.totalorder %s4176_s18, 1 }
  0x4c   : > { %v782_v6 = vunpack.c.l.bf16 %v766_v3  ;;  %v783_v9 = vunpack.c.h.bf16 %v766_v3  ;;  %v781_v12 = vunpack.c.h.bf16 %v765_v10  ;;  %v780_v13 = vunpack.c.l.bf16 %v765_v10  ;;  %v761_v15 = vld [vmem:[%s4264_s28 + $0x10] sm:$0xff]   ;;  %v759_v19 = vld [vmem:[%s4264_s28 + $0x8] sm:$0xff]   ;;  %v756_v20 = vld [vmem:[%s4264_s28] sm:$0xff]   ;;  %s5277_s0 = sld [smem:[#allocation32_spill]] }
  0x4d   : > { %816 = vadd.xlane.f32.xlu0 %v786_v4  ;;  %812 = vadd.xlane.f32.xlu1 %v784_v5  ;;  %v778_v14 = vunpack.c.l.bf16 %v762_v11  ;;  %v779_v16 = vunpack.c.h.bf16 %v762_v11  ;;  %v776_v17 = vunpack.c.l.bf16 %v761_v15  ;;  %v777_v18 = vunpack.c.h.bf16 %v761_v15  ;;  %s5291_s8 = smov (!%p734_p1, %s3048_s8), 31  ;;  %s5282_s26 = sld [smem:[#allocation33_spill]] }
  0x4e   : > { %808 = vadd.xlane.f32.xlu2 %v782_v6  ;;  %v775_v21 = vunpack.c.h.bf16 %v759_v19  ;;  %v774_v22 = vunpack.c.l.bf16 %v759_v19  ;;  %v772_v23 = vunpack.c.l.bf16 %v756_v20  ;;  %v773_v24 = vunpack.c.h.bf16 %v756_v20  ;;  %s3049_s10 = sshll.u32 %s5291_s8, 3 }
  0x4f   : > { %s740_s2 = scalar_select %p739_p4, %s4176_s18, 1 }
  0x50   : > { %s4356_s16 = scalar_lea.vmem %s5242_s3, %s3049_s10 }
  0x52   : > { %s741_s27 = scalar_lea.vmem %s5277_s0, %s740_s2 }
  0x55   : > { %818 = vadd.xlane.f32.xlu0 %v787_v7  ;;  %814 = vadd.xlane.f32.xlu1 %v785_v8 }
  0x56   : > { %810 = vadd.xlane.f32.xlu2 %v783_v9 }
  0x5d   : > { %806 = vadd.xlane.f32.xlu1 %v781_v12  ;;  %804 = vadd.xlane.f32.xlu0 %v780_v13  ;;  %v994_v12 = vld [vmem:[%s4356_s16 + $0x70] sm:$0xff] }
  0x5e   : > { %800 = vadd.xlane.f32.xlu2 %v778_v14 }
  0x65   : > { %802 = vadd.xlane.f32.xlu0 %v779_v16  ;;  %796 = vadd.xlane.f32.xlu1 %v776_v17  ;;  %v995_v16 = vld [vmem:[%s4356_s16 + $0x78] sm:$0xff]  ;;  %v992_v17 = vld [vmem:[%s4356_s16 + $0x60] sm:$0xff] }
  0x66   : > { %798 = vadd.xlane.f32.xlu2 %v777_v18 }
  0x6d   : > { %794 = vadd.xlane.f32.xlu1 %v775_v21  ;;  %792 = vadd.xlane.f32.xlu0 %v774_v22  ;;  %v990_v22 = vld [vmem:[%s4356_s16 + $0x50] sm:$0xff] }
  0x6e   : > { %788 = vadd.xlane.f32.xlu2 %v772_v23 }
  0x75   : > { %790 = vadd.xlane.f32.xlu0 %v773_v24 }
  0xc0   : > { %v4286_v25 = vpop.xlane.xlu0 %816  ;;  %v4288_v26 = vpop.xlane.xlu1 %812 }
  0xc1   : > { %3807 = vrsqrt.f32 %v4286_v25  ;;  %v4291_v27 = vpop.xlane.xlu2 %808  ;;  %vm966_vm0 = vweird.f32 %v4286_v25  ;;  %vm946_vm1 = vweird.f32 %v4288_v26 }
  0xc2   : > { %3809 = vrsqrt.f32 %v4288_v26  ;;  %vm926_vm3 = vweird.f32 %v4291_v27 }
  0xc3   : > { %3811 = vrsqrt.f32 %v4291_v27 }
  0xc7   : > { %v4295_v28 = vpop.eup %3807 }
  0xc8   : > { %v4297_v29 = vpop.eup %3809  ;;  %v961_v30 = vmul.f32 %v4295_v28, %v4286_v25  ;;  %v4301_v31 = vpop.xlane.xlu0 %818  ;;  %vm967_vm2 = vweird.f32 %v4295_v28 }
  0xc9   : > { %v4303_v32 = vpop.xlane.xlu1 %814  ;;  %v4306_v33 = vpop.eup %3811  ;;  %v941_v34 = vmul.f32 %v4297_v29, %v4288_v26  ;;  %3813 = vrsqrt.f32 %v4301_v31  ;;  %vm947_vm4 = vweird.f32 %v4297_v29  ;;  %vm976_vm5 = vweird.f32 %v4301_v31  ;;  %vm968_vm9 = vmor %vm966_vm0, %vm967_vm2 }
  0xca   : > { %v4311_v35 = vpop.xlane.xlu2 %810  ;;  %v962_v36 = vmul.f32 %v4295_v28, %v961_v30  ;;  %v921_v37 = vmul.f32 %v4306_v33, %v4291_v27  ;;  %3815 = vrsqrt.f32 %v4303_v32  ;;  %vm927_vm6 = vweird.f32 %v4306_v33  ;;  %vm948_vm12 = vmor %vm946_vm1, %vm947_vm4  ;;  %v993_v27 = vld [vmem:[%s4356_s16 + $0x68] sm:$0xff] }
  0xcb   : > { %v942_v38 = vmul.f32 %v4297_v29, %v941_v34  ;;  %3817 = vrsqrt.f32 %v4311_v35  ;;  %vm956_vm8 = vweird.f32 %v4303_v32  ;;  %vm936_vm11 = vweird.f32 %v4311_v35  ;;  %vm928_vm15 = vmor %vm926_vm3, %vm927_vm6 }
  0xcc   : > { %v963_v39 = vmul.f32 0.5, %v962_v36  ;;  %v922_v40 = vmul.f32 %v4306_v33, %v921_v37 }
  0xcd   : > { %v943_v41 = vmul.f32 0.5, %v942_v38 }
  0xce   : > { %v923_v43 = vmul.f32 0.5, %v922_v40  ;;  %v964_v45 = vsub.f32 1.5, %v963_v39  ;;  %v991_v40 = vld [vmem:[%s4356_s16 + $0x58] sm:$0xff] }
  0xcf   : > { %v3814_v42 = vpop.eup %3813  ;;  %v944_v50 = vsub.f32 1.5, %v943_v41 }
  0xd0   : > { %v4322_v44 = vpop.eup %3815  ;;  %v971_v46 = vmul.f32 %v3814_v42, %v4301_v31  ;;  %v4328_v48 = vpop.xlane.xlu0 %804  ;;  %v924_v55 = vsub.f32 1.5, %v923_v43  ;;  %v965_v57 = vmul.f32 %v4295_v28, %v964_v45  ;;  %vm977_vm7 = vweird.f32 %v3814_v42 }
  0xd1   : > { %v4326_v47 = vpop.xlane.xlu1 %806  ;;  %v4330_v49 = vpop.eup %3817  ;;  %v951_v51 = vmul.f32 %v4322_v44, %v4303_v32  ;;  %v945_v60 = vmul.f32 %v4297_v29, %v944_v50  ;;  %vm957_vm10 = vweird.f32 %v4322_v44  ;;  %vm978_vm13 = vmor %vm976_vm5, %vm977_vm7  ;;  %vm906_vm2 = vweird.f32 %v4328_v48 }
  0xd2   : > { %3819 = vrsqrt.f32 %v4326_v47  ;;  %v4336_v52 = vpop.xlane.xlu2 %800  ;;  %v972_v53 = vmul.f32 %v3814_v42, %v971_v46  ;;  %v931_v54 = vmul.f32 %v4330_v49, %v4311_v35  ;;  %v925_v1 = vmul.f32 %v4306_v33, %v924_v55  ;;  %vm958_vm1 = vmor %vm956_vm8, %vm957_vm10 }
  0xd3   : > { %v952_v56 = vmul.f32 %v4322_v44, %v951_v51  ;;  %3821 = vrsqrt.f32 %v4328_v48  ;;  %v4368_v3 = vsel %vm968_vm9, %v4295_v28, %v965_v57  ;;  %v4381_v9 = vsel %vm948_vm12, %v4297_v29, %v945_v60 }
  0xd4   : > { %v973_v58 = vmul.f32 0.5, %v972_v53  ;;  %v932_v59 = vmul.f32 %v4330_v49, %v931_v54  ;;  %3823 = vrsqrt.f32 %v4336_v52  ;;  %vm937_vm14 = vweird.f32 %v4330_v49 }
  0xd5   : > { %v953_v61 = vmul.f32 0.5, %v952_v56  ;;  %vm916_vm0 = vweird.f32 %v4326_v47  ;;  %v4408_v19 = vsel %vm928_vm15, %v4306_v33, %v925_v1  ;;  %vm886_vm3 = vweird.f32 %v4336_v52  ;;  %vm938_vm4 = vmor %vm936_vm11, %vm937_vm14 }
  0xd6   : > { %v974_v62 = vsub.f32 1.5, %v973_v58  ;;  %v933_v63 = vmul.f32 0.5, %v932_v59  ;;  %v1010_v26 = vmul.f32 %v994_v12, %v4368_v3  ;;  %v1008_v30 = vmul.f32 %v992_v17, %v4381_v9 }
  0xd7   : > { %v954_v2 = vsub.f32 1.5, %v953_v61  ;;  %v4438_v33 = vmul.f32 %v990_v22, %v4408_v19 }
  0xd8   : > { %v4358_v0 = vpop.eup %3819  ;;  %v975_v4 = vmul.f32 %v3814_v42, %v974_v62  ;;  %v934_v5 = vsub.f32 1.5, %v933_v63  ;;  %v4376_v7 = vpop.xlane.xlu0 %802  ;;  %v988_v62 = vld [vmem:[%s4356_s16 + $0x40] sm:$0xff]  ;;  %v989_v63 = vld [vmem:[%s4356_s16 + $0x48] sm:$0xff] }
  0xd9   : > { %v911_v6 = vmul.f32 %v4358_v0, %v4326_v47  ;;  %v4378_v8 = vpop.xlane.xlu1 %796  ;;  %v955_v10 = vmul.f32 %v4322_v44, %v954_v2  ;;  %3825 = vrsqrt.f32 %v4376_v7  ;;  %v4392_v13 = vpop.eup %3821  ;;  %vm917_vm5 = vweird.f32 %v4358_v0 }
  0xda   : > { %v4389_v11 = vpop.xlane.xlu2 %798  ;;  %v4398_v14 = vsel %vm978_vm13, %v3814_v42, %v975_v4  ;;  %v4405_v18 = vpop.eup %3823  ;;  %v935_v20 = vmul.f32 %v4330_v49, %v934_v5  ;;  %v901_v21 = vmul.f32 %v4392_v13, %v4328_v48  ;;  %vm896_vm6 = vweird.f32 %v4376_v7  ;;  %vm918_vm9 = vmor %vm916_vm0, %vm917_vm5 }
  0xdb   : > { %v912_v15 = vmul.f32 %v4358_v0, %v911_v6  ;;  %3827 = vrsqrt.f32 %v4389_v11  ;;  %v4420_v23 = vsel %vm958_vm1, %v4322_v44, %v955_v10  ;;  %v881_v25 = vmul.f32 %v4405_v18, %v4336_v52  ;;  %v987_v52 = vld [vmem:[%s4356_s16 + $0x38] sm:$0xff] }
  0xdc   : > { %v902_v28 = vmul.f32 %v4392_v13, %v901_v21  ;;  %3829 = vrsqrt.f32 %v4378_v8  ;;  %v1011_v29 = vmul.f32 %v995_v16, %v4398_v14  ;;  %v4443_v36 = vsel %vm938_vm4, %v4330_v49, %v935_v20  ;;  %v986_v21 = vld [vmem:[%s4356_s16 + $0x30] sm:$0xff] }
  0xdd   : > { %v913_v24 = vmul.f32 0.5, %v912_v15  ;;  %v882_v32 = vmul.f32 %v4405_v18, %v881_v25  ;;  %v1009_v39 = vmul.f32 %v993_v27, %v4420_v23  ;;  %vm907_vm7 = vweird.f32 %v4392_v13 }
  0xde   : > { %v903_v37 = vmul.f32 0.5, %v902_v28  ;;  %v1019_v38 = vpack.c.bf16 %v1011_v29, %v1010_v26  ;;  %vm887_vm8 = vweird.f32 %v4405_v18  ;;  %v1007_v54 = vmul.f32 %v991_v40, %v4443_v36  ;;  %vm908_vm10 = vmor %vm906_vm2, %vm907_vm7 }
  0xdf   : > { %v914_v31 = vsub.f32 1.5, %v913_v24  ;;  %v4440_v34 = vpop.eup %3825  ;;  %v883_v42 = vmul.f32 0.5, %v882_v32  ;;  %v1018_v58 = vpack.c.bf16 %v1009_v39, %v1008_v30  ;;  %vm876_vm11 = vweird.f32 %v4389_v11  ;;  %vm888_vm14 = vmor %vm886_vm3, %vm887_vm8 }
  0xe0   : > { %v891_v43 = vmul.f32 %v4440_v34, %v4376_v7  ;;  %v4455_v45 = vpop.xlane.xlu0 %792  ;;  %v904_v46 = vsub.f32 1.5, %v903_v37  ;;  %1068 = vmatpush.bf16.msra.mxu0 %v1019_v38  ;;  %vm897_vm12 = vweird.f32 %v4440_v34  ;;  %v1017_v6 = vpack.c.bf16 %v1007_v54, %v4438_v33  ;;  %v984_v37 = vld [vmem:[%s4356_s16 + $0x20] sm:$0xff]  ;;  %v985_v38 = vld [vmem:[%s4356_s16 + $0x28] sm:$0xff] }
  0xe1   : > { %v4447_v35 = vpop.eup %3827  ;;  %v915_v41 = vmul.f32 %v4358_v0, %v914_v31  ;;  %v4453_v44 = vpop.xlane.xlu1 %794  ;;  %v884_v50 = vsub.f32 1.5, %v883_v42  ;;  %vm898_vm15 = vmor %vm896_vm6, %vm897_vm12  ;;  %vm866_vm0 = vweird.f32 %v4378_v8  ;;  %vm846_vm8 = vweird.f32 %v4455_v45 }
  0xe2   : > { %v871_v49 = vmul.f32 %v4447_v35, %v4389_v11  ;;  %3831 = vrsqrt.f32 %v4453_v44  ;;  %v892_v51 = vmul.f32 %v4440_v34, %v891_v43  ;;  %v4463_v53 = vpop.xlane.xlu2 %788  ;;  %v4466_v55 = vpop.eup %3829  ;;  %v905_v56 = vmul.f32 %v4392_v13, %v904_v46 }
  0xe3   : > { %3833 = vrsqrt.f32 %v4455_v45  ;;  %v4476_v59 = vsel %vm918_vm9, %v4358_v0, %v915_v41  ;;  %v885_v60 = vmul.f32 %v4405_v18, %v884_v50  ;;  %v861_v47 = vmul.f32 %v4466_v55, %v4378_v8 }
  0xe4   : > { %v872_v57 = vmul.f32 %v4447_v35, %v871_v49  ;;  %v893_v61 = vmul.f32 0.5, %v892_v51  ;;  %v4488_v1 = vsel %vm908_vm10, %v4392_v13, %v905_v56  ;;  %3835 = vrsqrt.f32 %v4463_v53  ;;  %1069 = vmatpush.bf16.msra.mxu0 %v1018_v58  ;;  %v983_v56 = vld [vmem:[%s4356_s16 + $0x18] sm:$0xff] }
  0xe5   : > { %vm877_vm13 = vweird.f32 %v4447_v35  ;;  %v862_v0 = vmul.f32 %v4466_v55, %v861_v47  ;;  %v1004_v10 = vmul.f32 %v988_v62, %v4488_v1  ;;  %v1005_v12 = vmul.f32 %v989_v63, %v4476_v59 }
  0xe6   : > { %v873_v2 = vmul.f32 0.5, %v872_v57  ;;  %v894_v48 = vsub.f32 1.5, %v893_v61  ;;  %v4503_v13 = vsel %vm888_vm14, %v4405_v18, %v885_v60  ;;  %vm867_vm1 = vweird.f32 %v4466_v55  ;;  %vm878_vm2 = vmor %vm876_vm11, %vm877_vm13  ;;  %v982_v60 = vld [vmem:[%s4356_s16 + $0x10] sm:$0xff] }
  0xe7   : > { %v863_v16 = vmul.f32 0.5, %v862_v0  ;;  %v1016_v29 = vpack.c.bf16 %v1005_v12, %v1004_v10  ;;  %v1002_v30 = vmul.f32 %v986_v21, %v4503_v13  ;;  %vm868_vm3 = vmor %vm866_vm0, %vm867_vm1  ;;  %vm856_vm5 = vweird.f32 %v4453_v44  ;;  %v3591_v21 = vld [vmem:[%s4264_s28 + $0x10] sm:$0xff] }
  0xe8   : > { %v3832_v4 = vpop.eup %3831  ;;  %v874_v5 = vsub.f32 1.5, %v873_v2  ;;  %v895_v15 = vmul.f32 %v4440_v34, %v894_v48  ;;  %v4507_v20 = vpop.xlane.xlu0 %790  ;;  %1070 = vmatpush.bf16.msra.mxu0 %v1017_v6  ;;  %vm826_vm10 = vweird.f32 %v4463_v53  ;;  %v981_v6 = vld [vmem:[%s4356_s16 + $0x8] sm:$0xff]  ;;  %vm1177_vm0 = vcmask 1041408  }
  0xe9   : > { %v851_v17 = vmul.f32 %v3832_v4, %v4453_v44  ;;  %v3834_v22 = vpop.eup %3833  ;;  %3837 = vrsqrt.f32 %v4507_v20  ;;  %v864_v7 = vsub.f32 1.5, %v863_v16  ;;  %vm857_vm4 = vweird.f32 %v3832_v4 }
  0xea   : > { %v875_v24 = vmul.f32 %v4447_v35, %v874_v5  ;;  %v4520_v18 = vsel %vm898_vm15, %v4440_v34, %v895_v15  ;;  %v841_v26 = vmul.f32 %v3834_v22, %v4455_v45  ;;  %v3836_v27 = vpop.eup %3835  ;;  %vm847_vm6 = vweird.f32 %v3834_v22  ;;  %vm858_vm7 = vmor %vm856_vm5, %vm857_vm4  ;;  %v980_v5 = vld [vmem:[%s4356_s16] sm:$0xff] }
  0xeb   : > { %v852_v25 = vmul.f32 %v3832_v4, %v851_v17  ;;  %v1003_v31 = vmul.f32 %v987_v52, %v4520_v18  ;;  %v865_v32 = vmul.f32 %v4466_v55, %v864_v7  ;;  %v821_v11 = vmul.f32 %v3836_v27, %v4463_v53  ;;  %vm848_vm9 = vmor %vm846_vm8, %vm847_vm6  ;;  %v3589_v17 = vld [vmem:[%s4264_s28] sm:$0xff]  ;;  %v3592_v52 = vld [vmem:[%s4264_s28 + $0x18] sm:$0xff] }
  0xec   : > { %v4528_v28 = vsel %vm878_vm2, %v4447_v35, %v875_v24  ;;  %v842_v34 = vmul.f32 %v3834_v22, %v841_v26  ;;  %1071 = vmatpush.bf16.msra.mxu0 %v1016_v29  ;;  %vm827_vm11 = vweird.f32 %v3836_v27  ;;  %vm836_vm14 = vweird.f32 %v4507_v20  ;;  %v3594_v24 = vld [vmem:[%s4264_s28 + $0x28] sm:$0xff]  ;;  %v3595_v7 = vld [vmem:[%s4264_s28 + $0x30] sm:$0xff]  ;;  %v3596_v26 = vld [vmem:[%s4264_s28 + $0x38] sm:$0xff] }
  0xed   : > { %v853_v33 = vmul.f32 0.5, %v852_v25  ;;  %v1015_v39 = vpack.c.bf16 %v1003_v31, %v1002_v30  ;;  %v4541_v40 = vsel %vm868_vm3, %v4466_v55, %v865_v32  ;;  %v822_v42 = vmul.f32 %v3836_v27, %v821_v11  ;;  %vm828_vm13 = vmor %vm826_vm10, %vm827_vm11  ;;  %v1141_v25 = vld [vmem:[%s5191_s4] sm:$0xf] }
  0xee   : > { %v843_v41 = vmul.f32 0.5, %v842_v34  ;;  %v1000_v46 = vmul.f32 %v984_v37, %v4541_v40  ;;  %v1001_v8 = vmul.f32 %v985_v38, %v4528_v28  ;;  %1149 = vst [vmem:[#allocation1] ss:$4 sm:$0xff] %v1141_v25  ;;  %vm1152_vm1 = vcmask 31744   ;;  %v3628_v25 = vld [vmem:[%s5193_s6 + $0xf4] sm:$0xf0] }
  0xef   : > { %v854_v35 = vsub.f32 1.5, %v853_v33  ;;  %v3838_v43 = vpop.eup %3837  ;;  %v823_v51 = vmul.f32 0.5, %v822_v42 }
  0xf0   : > { %v844_v50 = vsub.f32 1.5, %v843_v41  ;;  %v831_v54 = vmul.f32 %v3838_v43, %v4507_v20  ;;  %1072 = vmatpush.bf16.msra.mxu0 %v1015_v39  ;;  %v1014_v61 = vpack.c.bf16 %v1001_v8, %v1000_v46  ;;  %vm837_vm12 = vweird.f32 %v3838_v43  ;;  %v3590_v20 = vld [vmem:[%s4264_s28 + $0x8] sm:$0xff] }
  0xf1   : > { %v855_v49 = vmul.f32 %v3832_v4, %v854_v35  ;;  %v824_v57 = vsub.f32 1.5, %v823_v51  ;;  %vm838_vm15 = vmor %vm836_vm14, %vm837_vm12  ;;  %vm2877_vm12 = vcmask 523264  }
  0xf2   : > { %v845_v44 = vmul.f32 %v3834_v22, %v844_v50  ;;  %v832_v58 = vmul.f32 %v3838_v43, %v831_v54 }
  0xf3   : > { %v4550_v55 = vsel %vm858_vm7, %v3832_v4, %v855_v49  ;;  %v825_v63 = vmul.f32 %v3836_v27, %v824_v57 }
  0xf4   : > { %5243 = vst [vmem:[#allocation14_spill] sm:$0xff] %v4550_v55  ;;  %v999_v47 = vmul.f32 %v983_v56, %v4550_v55  ;;  %v4556_v62 = vsel %vm848_vm9, %v3834_v22, %v845_v44  ;;  %v833_v45 = vmul.f32 0.5, %v832_v58  ;;  %1073 = vmatpush.bf16.msra.mxu0 %v1014_v61  ;;  %v3593_v22 = vld [vmem:[%s4264_s28 + $0x20] sm:$0xff] }
  0xf5   : > { %5244 = vst [vmem:[#allocation15_spill] sm:$0xff] %v4556_v62  ;;  %v998_v2 = vmul.f32 %v982_v60, %v4556_v62  ;;  %v4559_v53 = vsel %vm828_vm13, %v3836_v27, %v825_v63  ;;  %v1150_v27 = vld.sshfl [vmem:[#allocation1] sm:$0xff pattern:$0x73625140]  ;;  %vm2890_vm13 = vcmask 7168  }
  0xf6   : > { %v834_v48 = vsub.f32 1.5, %v833_v45  ;;  %5245 = vst [vmem:[#allocation16_spill] sm:$0xff] %v4559_v53  ;;  %v996_v12 = vmul.f32 %v980_v5, %v4559_v53  ;;  %v1151_v29 = vld.sshfl [vmem:[#allocation1 + $0x8] sm:$0xff pattern:$0x73625140]  ;;  %v1178_v30 = vsel %vm1177_vm0, %v1150_v27, 0 }
  0xf7   : > { %v1013_v0 = vpack.c.bf16 %v999_v47, %v998_v2  ;;  %v1180_v31 = vsel %vm1177_vm0, %v1151_v29, 0  ;;  %1189 = vmatpush.bf16.msra.mxu1 %v1178_v30  ;;  %v3161_v5 = vld [vmem:[%s5193_s6 + $0x70] sm:$0xf]  ;;  %v3627_v29 = vld [vmem:[%s5193_s6 + $0xf4] sm:$0xf] }
  0xf8   : > { %v835_v4 = vmul.f32 %v3838_v43, %v834_v48  ;;  %1238 = vmatpush.bf16.msra.mxu2 %v1180_v31  ;;  %v3227_v30 = vld [vmem:[%s5193_s6 + $0xf8] sm:$0xf0]  ;;  %v3145_v31 = vld [vmem:[%s5193_s6 + $0x50] sm:$0xf] }
  0xf9   : > { %1074 = vmatpush.bf16.msra.mxu0 %v1013_v0 }
  0xfa   : > { %v4564_v10 = vsel %vm838_vm15, %v3838_v43, %v835_v4 }
  0xfb   : > { %5246 = vst [vmem:[#allocation17_spill] sm:$0xff] %v4564_v10  ;;  %v997_v15 = vmul.f32 %v981_v6, %v4564_v10  ;;  %v3612_v6 = vld [vmem:[%s5193_s6 + $0x74] sm:$0xf0] }
  0xfd   : > { %v1012_v16 = vpack.c.bf16 %v997_v15, %v996_v12  ;;  %v3611_v12 = vld [vmem:[%s5193_s6 + $0x74] sm:$0xf]  ;;  %v3162_v15 = vor.u32 %v3612_v6, %v3161_v5  ;;  %v3604_v5 = vld [vmem:[%s5193_s6 + $0x34] sm:$0xf0] }
  0xfe   : > { %v3603_v6 = vld [vmem:[%s5193_s6 + $0x34] sm:$0xf] }
  0xff   : > { %1075 = vmatpush.bf16.msra.mxu0 %v1012_v16  ;;  %v3163_v16 = vld [vmem:[%s5193_s6 + $0x78] sm:$0xf0]  ;;  %1520 = vmatpush.bf16.msra.mxu3 %v3162_v15 }
 0x100   : > { %v3131_v15 = vld [vmem:[%s5193_s6 + $0x38] sm:$0xf0] }
 0x102   : > { %1076 = vmatmul.bf16.vlgmr.msra.gmra.mxu0 %v3589_v17  ;;  %v3166_v17 = vor.u32 %v3611_v12, %v3163_v16  ;;  %v3201_v16 = vld [vmem:[%s5193_s6 + $0xc0] sm:$0xf] }
 0x104   : > { %1618 = vmatpush.bf16.msrb.mxu2 %v3166_v17  ;;  %v3622_v17 = vld [vmem:[%s5193_s6 + $0xc4] sm:$0xf0] }
 0x112   : > { %1081 = vmatmul.bf16.gmra.mxu0 %v3590_v20  ;;  %v3153_v20 = vld [vmem:[%s5193_s6 + $0x60] sm:$0xf] }
 0x122   : > { %1086 = vmatmul.bf16.gmra.mxu0 %v3591_v21  ;;  %v3610_v21 = vld [vmem:[%s5193_s6 + $0x64] sm:$0xf0] }
 0x132   : > { %1091 = vmatmul.bf16.gmra.mxu0 %v3592_v52  ;;  %v3609_v52 = vld [vmem:[%s5193_s6 + $0x64] sm:$0xf] }
 0x142   : > { %1096 = vmatmul.bf16.gmra.mxu0 %v3593_v22  ;;  %v3154_v22 = vor.u32 %v3610_v21, %v3153_v20  ;;  %v3134_v20 = vor.u32 %v3603_v6, %v3131_v15  ;;  %v3202_v21 = vor.u32 %v3622_v17, %v3201_v16  ;;  %v3169_v16 = vld [vmem:[%s5193_s6 + $0x80] sm:$0xf]  ;;  %v3614_v17 = vld [vmem:[%s5193_s6 + $0x84] sm:$0xf0] }
 0x144   : > { %1521 = vmatpush.bf16.msra.mxu3 %v3154_v22  ;;  %v3203_v22 = vld [vmem:[%s5193_s6 + $0xc8] sm:$0xf0] }
 0x152   : > { %1101 = vmatmul.bf16.gmra.mxu0 %v3594_v24  ;;  %v3155_v24 = vld [vmem:[%s5193_s6 + $0x68] sm:$0xf0] }
 0x162   : > { %1106 = vmatmul.bf16.gmra.mxu0 %v3595_v7  ;;  %v3225_v7 = vld [vmem:[%s5193_s6 + $0xf0] sm:$0xf] }
 0x163   : > { %v3226_v27 = vor.u32 %v3628_v25, %v3225_v7 }
 0x165   : > { %1569 = vmatpush.bf16.msrb.mxu1 %v3226_v27  ;;  %v3601_v27 = vld [vmem:[%s5193_s6 + $0x24] sm:$0xf] }
 0x172   : > { %1111 = vmatmul.bf16.gmra.mxu0 %v3596_v26  ;;  %v3158_v26 = vor.u32 %v3609_v52, %v3155_v24  ;;  %v3621_v52 = vld [vmem:[%s5193_s6 + $0xc4] sm:$0xf]  ;;  %v3121_v24 = vld [vmem:[%s5193_s6 + $0x20] sm:$0xf] }
 0x173   : > { %v3206_v25 = vor.u32 %v3621_v52, %v3203_v22  ;;  %v3171_v52 = vld [vmem:[%s5193_s6 + $0x88] sm:$0xf0] }
 0x174   : > { %1619 = vmatpush.bf16.msrb.mxu2 %v3158_v26  ;;  %v3602_v26 = vld [vmem:[%s5193_s6 + $0x24] sm:$0xf0] }
 0x17f   : > { %v1077_v32 = vpop.f32.mrf.mxu0 }
 0x180   : > { %v1117_v34 = vmul.f32 %v1077_v32, %v4559_v53 }
 0x187   : > { %v1079_v33 = vpop.f32.mrf.mxu0 }
 0x188   : > { %v1118_v11 = vmul.f32 %v1079_v33, %v4564_v10  ;;  %v3230_v33 = vor.u32 %v3627_v29, %v3227_v30  ;;  %v3123_v29 = vld [vmem:[%s5193_s6 + $0x28] sm:$0xf0]  ;;  %v3122_v30 = vor.u32 %v3602_v26, %v3121_v24  ;;  %v1142_v24 = vld [vmem:[%s5192_s5] sm:$0x3] }
 0x18a   : > { %v1133_v37 = vpack.c.bf16 %v1118_v11, %v1117_v34  ;;  %v3608_v34 = vld [vmem:[%s5193_s6 + $0x54] sm:$0xf0]  ;;  %v3607_v11 = vld [vmem:[%s5193_s6 + $0x54] sm:$0xf]  ;;  %1667 = vmatpush.bf16.msrb.mxu0 %v3230_v33 }
 0x18b   : > { %v3620_v33 = vld [vmem:[%s5193_s6 + $0xb4] sm:$0xf0] }
 0x18c   : > { %3087 = vmatmul.msk.bf16.vlgmr.msra.gmra.mxu1 %vm1152_vm1, %v1133_v37  ;;  %3095 = vmatmul.msk.bf16.vlgmr.msra.gmra.mxu2 %vm1152_vm1, %v1133_v37  ;;  %v3147_v37 = vld [vmem:[%s5193_s6 + $0x58] sm:$0xf0] }
 0x18f   : > { %v1082_v38 = vpop.f32.mrf.mxu0 }
 0x190   : > { %v1119_v35 = vmul.f32 %v1082_v38, %v4556_v62  ;;  %v3217_v38 = vld [vmem:[%s5193_s6 + $0xe0] sm:$0xf] }
 0x197   : > { %v1084_v39 = vpop.f32.mrf.mxu0 }
 0x198   : > { %v1120_v41 = vmul.f32 %v1084_v39, %v4550_v55  ;;  %v3626_v39 = vld [vmem:[%s5193_s6 + $0xe4] sm:$0xf0] }
 0x19a   : > { %v1134_v42 = vpack.c.bf16 %v1120_v41, %v1119_v35  ;;  %v3625_v35 = vld [vmem:[%s5193_s6 + $0xe4] sm:$0xf]  ;;  %v3146_v41 = vor.u32 %v3608_v34, %v3145_v31  ;;  %v3126_v31 = vor.u32 %v3601_v27, %v3123_v29  ;;  %v3619_v34 = vld [vmem:[%s5193_s6 + $0xb4] sm:$0xf] }
 0x19c   : > { %3088 = vmatmul.msk.bf16.gmra.mxu1 %vm1152_vm1, %v1134_v42  ;;  %3096 = vmatmul.msk.bf16.gmra.mxu2 %vm1152_vm1, %v1134_v42  ;;  %v3218_v42 = vor.u32 %v3626_v39, %v3217_v38  ;;  %v3113_v39 = vld [vmem:[%s5193_s6 + $0x10] sm:$0xf] }
 0x19d   : > { %1522 = vmatpush.bf16.msra.mxu3 %v3146_v41  ;;  %v3599_v41 = vld [vmem:[%s5193_s6 + $0x14] sm:$0xf] }
 0x19e   : > { %1570 = vmatpush.bf16.msrb.mxu1 %v3218_v42 }
 0x19f   : > { %v1087_v43 = vpop.f32.mrf.mxu0 }
 0x1a0   : > { %v1121_v8 = vmul.f32 %v1087_v43, %v4541_v40  ;;  %v3219_v43 = vld [vmem:[%s5193_s6 + $0xe8] sm:$0xf0] }
 0x1a7   : > { %v1089_v46 = vpop.f32.mrf.mxu0 }
 0x1a8   : > { %v1122_v49 = vmul.f32 %v1089_v46, %v4528_v28  ;;  %v3137_v46 = vld [vmem:[%s5193_s6 + $0x40] sm:$0xf] }
 0x1aa   : > { %v1135_v50 = vpack.c.bf16 %v1122_v49, %v1121_v8  ;;  %v3606_v8 = vld [vmem:[%s5193_s6 + $0x44] sm:$0xf0]  ;;  %v3150_v49 = vor.u32 %v3607_v11, %v3147_v37  ;;  %v3195_v37 = vld [vmem:[%s5193_s6 + $0xb8] sm:$0xf0] }
 0x1ab   : > { %v3198_v38 = vor.u32 %v3619_v34, %v3195_v37 }
 0x1ac   : > { %3089 = vmatmul.msk.bf16.gmra.mxu1 %vm1152_vm1, %v1135_v50  ;;  %3097 = vmatmul.msk.bf16.gmra.mxu2 %vm1152_vm1, %v1135_v50  ;;  %v3222_v50 = vor.u32 %v3625_v35, %v3219_v43  ;;  %v3600_v35 = vld [vmem:[%s5193_s6 + $0x14] sm:$0xf0]  ;;  %v3115_v43 = vld [vmem:[%s5193_s6 + $0x18] sm:$0xf0] }
 0x1ad   : > { %1620 = vmatpush.bf16.msrb.mxu2 %v3150_v49  ;;  %v3114_v42 = vor.u32 %v3600_v35, %v3113_v39  ;;  %v3118_v49 = vor.u32 %v3599_v41, %v3115_v43 }
 0x1ae   : > { %1668 = vmatpush.bf16.msrb.mxu0 %v3222_v50 }
 0x1af   : > { %v1092_v51 = vpop.f32.mrf.mxu0 }
 0x1b0   : > { %v1123_v56 = vmul.f32 %v1092_v51, %v4503_v13  ;;  %v3605_v51 = vld [vmem:[%s5193_s6 + $0x44] sm:$0xf] }
 0x1b7   : > { %v1094_v54 = vpop.f32.mrf.mxu0 }
 0x1b8   : > { %v1124_v44 = vmul.f32 %v1094_v54, %v4520_v18  ;;  %v3139_v54 = vld [vmem:[%s5193_s6 + $0x48] sm:$0xf0] }
 0x1ba   : > { %v1136_v57 = vpack.c.bf16 %v1124_v44, %v1123_v56  ;;  %v3209_v56 = vld [vmem:[%s5193_s6 + $0xd0] sm:$0xf]  ;;  %v3624_v44 = vld [vmem:[%s5193_s6 + $0xd4] sm:$0xf0] }
 0x1bc   : > { %3090 = vmatmul.msk.bf16.gmra.mxu1 %vm1152_vm1, %v1136_v57  ;;  %3098 = vmatmul.msk.bf16.gmra.mxu2 %vm1152_vm1, %v1136_v57  ;;  %v3623_v57 = vld [vmem:[%s5193_s6 + $0xd4] sm:$0xf] }
 0x1bf   : > { %v1097_v58 = vpop.f32.mrf.mxu0 }
 0x1c0   : > { %v1125_v61 = vmul.f32 %v1097_v58, %v4488_v1  ;;  %v3211_v58 = vld [vmem:[%s5193_s6 + $0xd8] sm:$0xf0] }
 0x1c7   : > { %v1099_v60 = vpop.f32.mrf.mxu0 }
 0x1c8   : > { %v1126_v47 = vmul.f32 %v1099_v60, %v4476_v59  ;;  %v3210_v60 = vor.u32 %v3624_v44, %v3209_v56  ;;  %v3105_v56 = vld [vmem:[%s5193_s6] sm:$0xf] }
 0x1ca   : > { %v1137_v63 = vpack.c.bf16 %v1126_v47, %v1125_v61  ;;  %v3138_v61 = vor.u32 %v3606_v8, %v3137_v46  ;;  %v3214_v47 = vor.u32 %v3623_v57, %v3211_v58  ;;  %1571 = vmatpush.bf16.msrb.mxu1 %v3210_v60  ;;  %v3185_v46 = vld [vmem:[%s5193_s6 + $0xa0] sm:$0xf]  ;;  %v3618_v8 = vld [vmem:[%s5193_s6 + $0xa4] sm:$0xf0]  ;;  %v3597_v60 = vld [vmem:[%s5193_s6 + $0x4] sm:$0xf] }
 0x1cb   : > { %v3186_v50 = vor.u32 %v3618_v8, %v3185_v46  ;;  %v3598_v58 = vld [vmem:[%s5193_s6 + $0x4] sm:$0xf0] }
 0x1cc   : > { %3091 = vmatmul.msk.bf16.gmra.mxu1 %vm1152_vm1, %v1137_v63  ;;  %3099 = vmatmul.msk.bf16.gmra.mxu2 %vm1152_vm1, %v1137_v63  ;;  %v3142_v63 = vor.u32 %v3605_v51, %v3139_v54  ;;  %v3617_v51 = vld [vmem:[%s5193_s6 + $0xa4] sm:$0xf]  ;;  %v3187_v54 = vld [vmem:[%s5193_s6 + $0xa8] sm:$0xf0] }
 0x1cd   : > { %1523 = vmatpush.bf16.msra.mxu3 %v3138_v61  ;;  %1669 = vmatpush.bf16.msrb.mxu0 %v3214_v47  ;;  %v3190_v57 = vor.u32 %v3617_v51, %v3187_v54  ;;  %v3107_v61 = vld [vmem:[%s5193_s6 + $0x8] sm:$0xf0] }
 0x1ce   : > { %1621 = vmatpush.bf16.msrb.mxu2 %v3142_v63  ;;  %1572 = vmatpush.bf16.msrb.mxu1 %v3202_v21  ;;  %v3170_v21 = vor.u32 %v3614_v17, %v3169_v16 }
 0x1cf   : > { %v1102_v45 = vpop.f32.mrf.mxu0 }
 0x1d0   : > { %v1127_v48 = vmul.f32 %v1102_v45, %v4408_v19 }
 0x1d1   : > { %1670 = vmatpush.bf16.msrb.mxu0 %v3206_v25  ;;  %v4806_v25 = vperm.slane %v1142_v24, 0 }
 0x1d2   : > { %1622 = vmatpush.bf16.msrb.mxu2 %v3134_v20  ;;  %v3613_v20 = vld [vmem:[%s5193_s6 + $0x84] sm:$0xf] }
 0x1d3   : > { %v3174_v22 = vor.u32 %v3613_v20, %v3171_v52 }
 0x1d5   : > { %1671 = vmatpush.bf16.msrb.mxu0 %v3198_v38 }
 0x1d6   : > { %1623 = vmatpush.bf16.msrb.mxu2 %v3126_v31 }
 0x1d7   : > { %v1104_v2 = vpop.f32.mrf.mxu0 }
 0x1d8   : > { %v1128_v0 = vmul.f32 %v1104_v2, %v4443_v36 }
 0x1d9   : > { %1672 = vmatpush.bf16.msrb.mxu0 %v3190_v57 }
 0x1da   : > { %v1138_v4 = vpack.c.bf16 %v1128_v0, %v1127_v48  ;;  %1624 = vmatpush.bf16.msrb.mxu2 %v3118_v49 }
 0x1dc   : > { %3092 = vmatmul.msk.bf16.gmra.mxu1 %vm1152_vm1, %v1138_v4  ;;  %3100 = vmatmul.msk.bf16.gmra.mxu2 %vm1152_vm1, %v1138_v4  ;;  %v3129_v4 = vld [vmem:[%s5193_s6 + $0x30] sm:$0xf] }
 0x1dd   : > { %v3130_v12 = vor.u32 %v3604_v5, %v3129_v4  ;;  %v3616_v4 = vld [vmem:[%s5193_s6 + $0x94] sm:$0xf0]  ;;  %v3615_v5 = vld [vmem:[%s5193_s6 + $0x94] sm:$0xf] }
 0x1df   : > { %v1107_v32 = vpop.f32.mrf.mxu0  ;;  %1524 = vmatpush.bf16.msra.mxu3 %v3130_v12  ;;  %v3179_v12 = vld [vmem:[%s5193_s6 + $0x98] sm:$0xf0] }
 0x1e0   : > { %v1129_v2 = vmul.f32 %v1107_v32, %v4381_v9  ;;  %v3193_v32 = vld [vmem:[%s5193_s6 + $0xb0] sm:$0xf]  ;;  %v3182_v15 = vor.u32 %v3615_v5, %v3179_v12 }
 0x1e1   : > { %v3194_v11 = vor.u32 %v3620_v33, %v3193_v32 }
 0x1e2   : > { %1673 = vmatpush.bf16.msrb.mxu0 %v3182_v15 }
 0x1e3   : > { %1525 = vmatpush.bf16.msra.mxu3 %v3122_v30  ;;  %1573 = vmatpush.bf16.msrb.mxu1 %v3194_v11  ;;  %v4809_v30 = vperm.slane %v1142_v24, 1 }
 0x1e6   : > { %1674 = vmatpush.bf16.msrb.mxu0 %v3174_v22 }
 0x1e7   : > { %v1109_v45 = vpop.f32.mrf.mxu0  ;;  %1526 = vmatpush.bf16.msra.mxu3 %v3114_v42  ;;  %1574 = vmatpush.bf16.msrb.mxu1 %v3186_v50 }
 0x1e8   : > { %v1130_v48 = vmul.f32 %v1109_v45, %v4420_v23  ;;  %v3106_v45 = vor.u32 %v3598_v58, %v3105_v56 }
 0x1ea   : > { %v1139_v0 = vpack.c.bf16 %v1130_v48, %v1129_v2  ;;  %v3110_v2 = vor.u32 %v3597_v60, %v3107_v61 }
 0x1eb   : > { %1527 = vmatpush.bf16.msra.mxu3 %v3106_v45 }
 0x1ec   : > { %3093 = vmatmul.msk.bf16.gmra.mxu1 %vm1152_vm1, %v1139_v0  ;;  %3101 = vmatmul.msk.bf16.gmra.mxu2 %vm1152_vm1, %v1139_v0  ;;  %v3177_v0 = vld [vmem:[%s5193_s6 + $0x90] sm:$0xf] }
 0x1ed   : > { %v3178_v6 = vor.u32 %v3616_v4, %v3177_v0  ;;  %1625 = vmatpush.bf16.msrb.mxu2 %v3110_v2 }
 0x1ef   : > { %v1112_v7 = vpop.f32.mrf.mxu0  ;;  %1575 = vmatpush.bf16.msrb.mxu1 %v3178_v6 }
 0x1f0   : > { %v1131_v47 = vmul.f32 %v1112_v7, %v4368_v3 }
 0x1f3   : > { %1576 = vmatpush.bf16.msrb.mxu1 %v3170_v21 }
 0x1f7   : > { %v1114_v44 = vpop.f32.mrf.mxu0 }
 0x1f8   : > { %v1132_v63 = vmul.f32 %v1114_v44, %v4398_v14 }
 0x1fa   : > { %v1140_v48 = vpack.c.bf16 %v1132_v63, %v1131_v47 }
 0x1fc   : > { %3094 = vmatmul.msk.bf16.gmra.mxu1 %vm1152_vm1, %v1140_v48  ;;  %3102 = vmatmul.msk.bf16.gmra.mxu2 %vm1152_vm1, %v1140_v48 }
 0x209   : > { %v1191_v7 = vpop.f32.mrf.mxu1 }
 0x20a   : > { %v1192_v27 = vadd.f32 %v1191_v7, %v4806_v25 }
 0x20c   : > { %v1280_v32 = vmax.f32 %v1192_v27, 0.0 }
 0x20f   : > { %v1240_v26 = vpop.f32.mrf.mxu2 }
 0x210   : > { %v1241_v34 = vadd.f32 %v1240_v26, %v4809_v30 }
 0x211   : > { %v1193_v29 = vpop.f32.mrf.mxu1 }
 0x212   : > { %v1194_v31 = vadd.f32 %v1193_v29, %v4806_v25  ;;  %v1281_v35 = vmax.f32 %v1241_v34, 0.0 }
 0x214   : > { %v1282_v33 = vmax.f32 %v1194_v31, 0.0 }
 0x216   : > { %v1312_v11 = vpack.c.bf16 %v1282_v33, %v1280_v32 }
 0x217   : > { %v1242_v37 = vpop.f32.mrf.mxu2 }
 0x218   : > { %v1243_v38 = vadd.f32 %v1242_v37, %v4809_v30  ;;  %1528 = vmatmul.bf16.vlgmr.msra.gmra.mxu3 %v1312_v11  ;;  %1626 = vmatmul.bf16.vlgmr.msrb.gmra.mxu2 %v1312_v11 }
 0x219   : > { %v1196_v39 = vpop.f32.mrf.mxu1 }
 0x21a   : > { %v1283_v41 = vmax.f32 %v1243_v38, 0.0  ;;  %v1197_v46 = vadd.f32 %v1196_v39, %v4806_v25 }
 0x21c   : > { %v1313_v42 = vpack.c.bf16 %v1283_v41, %v1281_v35  ;;  %v1284_v50 = vmax.f32 %v1197_v46, 0.0 }
 0x21e   : > { %1577 = vmatmul.bf16.vlgmr.msrb.gmra.mxu1 %v1313_v42  ;;  %1675 = vmatmul.bf16.vlgmr.msrb.gmra.mxu0 %v1313_v42 }
 0x21f   : > { %v1245_v43 = vpop.f32.mrf.mxu2 }
 0x220   : > { %v1246_v54 = vadd.f32 %v1245_v43, %v4809_v30 }
 0x221   : > { %v1198_v8 = vpop.f32.mrf.mxu1 }
 0x222   : > { %v1199_v49 = vadd.f32 %v1198_v8, %v4806_v25  ;;  %v1285_v60 = vmax.f32 %v1246_v54, 0.0 }
 0x224   : > { %v1286_v51 = vmax.f32 %v1199_v49, 0.0 }
 0x226   : > { %v1314_v56 = vpack.c.bf16 %v1286_v51, %v1284_v50 }
 0x227   : > { %v1247_v44 = vpop.f32.mrf.mxu2 }
 0x228   : > { %v1248_v57 = vadd.f32 %v1247_v44, %v4809_v30  ;;  %1533 = vmatmul.bf16.gmra.mxu3 %v1314_v56  ;;  %1631 = vmatmul.bf16.gmra.mxu2 %v1314_v56 }
 0x229   : > { %v1201_v58 = vpop.f32.mrf.mxu1 }
 0x22a   : > { %v1287_v61 = vmax.f32 %v1248_v57, 0.0  ;;  %v1202_v45 = vadd.f32 %v1201_v58, %v4806_v25 }
 0x22c   : > { %v1315_v47 = vpack.c.bf16 %v1287_v61, %v1285_v60  ;;  %v1288_v0 = vmax.f32 %v1202_v45, 0.0 }
 0x22e   : > { %1582 = vmatmul.bf16.gmra.mxu1 %v1315_v47  ;;  %1680 = vmatmul.bf16.gmra.mxu0 %v1315_v47 }
 0x22f   : > { %v1250_v63 = vpop.f32.mrf.mxu2 }
 0x230   : > { %v1251_v5 = vadd.f32 %v1250_v63, %v4809_v30 }
 0x231   : > { %v1203_v2 = vpop.f32.mrf.mxu1 }
 0x232   : > { %v1204_v48 = vadd.f32 %v1203_v2, %v4806_v25  ;;  %v1289_v17 = vmax.f32 %v1251_v5, 0.0 }
 0x234   : > { %v1290_v4 = vmax.f32 %v1204_v48, 0.0 }
 0x236   : > { %v1316_v6 = vpack.c.bf16 %v1290_v4, %v1288_v0 }
 0x237   : > { %v1252_v12 = vpop.f32.mrf.mxu2 }
 0x238   : > { %v1253_v15 = vadd.f32 %v1252_v12, %v4809_v30  ;;  %1538 = vmatmul.bf16.gmra.mxu3 %v1316_v6  ;;  %1636 = vmatmul.bf16.gmra.mxu2 %v1316_v6 }
 0x239   : > { %v1206_v16 = vpop.f32.mrf.mxu1 }
 0x23a   : > { %v1291_v20 = vmax.f32 %v1253_v15, 0.0  ;;  %v1207_v22 = vadd.f32 %v1206_v16, %v4806_v25 }
 0x23c   : > { %v1317_v21 = vpack.c.bf16 %v1291_v20, %v1289_v17  ;;  %v1292_v26 = vmax.f32 %v1207_v22, 0.0 }
 0x23e   : > { %1587 = vmatmul.bf16.gmra.mxu1 %v1317_v21  ;;  %1685 = vmatmul.bf16.gmra.mxu0 %v1317_v21 }
 0x23f   : > { %v1255_v52 = vpop.f32.mrf.mxu2 }
 0x240   : > { %v1256_v29 = vadd.f32 %v1255_v52, %v4809_v30 }
 0x241   : > { %v1208_v24 = vpop.f32.mrf.mxu1 }
 0x242   : > { %v1209_v7 = vadd.f32 %v1208_v24, %v4806_v25  ;;  %v1293_v11 = vmax.f32 %v1256_v29, 0.0 }
 0x244   : > { %v1294_v27 = vmax.f32 %v1209_v7, 0.0 }
 0x246   : > { %v1318_v31 = vpack.c.bf16 %v1294_v27, %v1292_v26 }
 0x247   : > { %v1257_v32 = vpop.f32.mrf.mxu2 }
 0x248   : > { %v1258_v33 = vadd.f32 %v1257_v32, %v4809_v30  ;;  %1543 = vmatmul.bf16.gmra.mxu3 %v1318_v31  ;;  %1641 = vmatmul.bf16.gmra.mxu2 %v1318_v31 }
 0x249   : > { %v1211_v34 = vpop.f32.mrf.mxu1 }
 0x24a   : > { %v1295_v37 = vmax.f32 %v1258_v33, 0.0  ;;  %v1212_v35 = vadd.f32 %v1211_v34, %v4806_v25 }
 0x24c   : > { %v1319_v38 = vpack.c.bf16 %v1295_v37, %v1293_v11  ;;  %v1296_v43 = vmax.f32 %v1212_v35, 0.0 }
 0x24e   : > { %1592 = vmatmul.bf16.gmra.mxu1 %v1319_v38  ;;  %1690 = vmatmul.bf16.gmra.mxu0 %v1319_v38 }
 0x24f   : > { %v1260_v39 = vpop.f32.mrf.mxu2 }
 0x250   : > { %v1261_v8 = vadd.f32 %v1260_v39, %v4809_v30 }
 0x251   : > { %v1213_v41 = vpop.f32.mrf.mxu1 }
 0x252   : > { %v1214_v42 = vadd.f32 %v1213_v41, %v4806_v25  ;;  %v1297_v56 = vmax.f32 %v1261_v8, 0.0 }
 0x254   : > { %v1298_v46 = vmax.f32 %v1214_v42, 0.0 }
 0x256   : > { %v1320_v49 = vpack.c.bf16 %v1298_v46, %v1296_v43 }
 0x257   : > { %v1262_v50 = vpop.f32.mrf.mxu2 }
 0x258   : > { %v1263_v51 = vadd.f32 %v1262_v50, %v4809_v30  ;;  %1548 = vmatmul.bf16.gmra.mxu3 %v1320_v49  ;;  %1646 = vmatmul.bf16.gmra.mxu2 %v1320_v49 }
 0x259   : > { %v1216_v54 = vpop.f32.mrf.mxu1 }
 0x25a   : > { %v1299_v44 = vmax.f32 %v1263_v51, 0.0  ;;  %v1217_v60 = vadd.f32 %v1216_v54, %v4806_v25 }
 0x25c   : > { %v1321_v57 = vpack.c.bf16 %v1299_v44, %v1297_v56  ;;  %v1300_v63 = vmax.f32 %v1217_v60, 0.0 }
 0x25e   : > { %1597 = vmatmul.bf16.gmra.mxu1 %v1321_v57  ;;  %1695 = vmatmul.bf16.gmra.mxu0 %v1321_v57 }
 0x25f   : > { %v1265_v58 = vpop.f32.mrf.mxu2 }
 0x260   : > { %v1266_v2 = vadd.f32 %v1265_v58, %v4809_v30 }
 0x261   : > { %v1218_v61 = vpop.f32.mrf.mxu1 }
 0x262   : > { %v1219_v47 = vadd.f32 %v1218_v61, %v4806_v25  ;;  %v1301_v6 = vmax.f32 %v1266_v2, 0.0 }
 0x264   : > { %v1302_v45 = vmax.f32 %v1219_v47, 0.0 }
 0x266   : > { %v1322_v48 = vpack.c.bf16 %v1302_v45, %v1300_v63 }
 0x267   : > { %v1267_v0 = vpop.f32.mrf.mxu2 }
 0x268   : > { %v1268_v4 = vadd.f32 %v1267_v0, %v4809_v30  ;;  %1553 = vmatmul.bf16.gmra.mxu3 %v1322_v48  ;;  %1651 = vmatmul.bf16.gmra.mxu2 %v1322_v48 }
 0x269   : > { %v1221_v5 = vpop.f32.mrf.mxu1 }
 0x26a   : > { %v1303_v12 = vmax.f32 %v1268_v4, 0.0  ;;  %v1222_v17 = vadd.f32 %v1221_v5, %v4806_v25 }
 0x26c   : > { %v1323_v15 = vpack.c.bf16 %v1303_v12, %v1301_v6  ;;  %v1304_v52 = vmax.f32 %v1222_v17, 0.0 }
 0x26e   : > { %1602 = vmatmul.bf16.gmra.mxu1 %v1323_v15  ;;  %1700 = vmatmul.bf16.gmra.mxu0 %v1323_v15 }
 0x26f   : > { %v1270_v16 = vpop.f32.mrf.mxu2 }
 0x270   : > { %v1271_v24 = vadd.f32 %v1270_v16, %v4809_v30 }
 0x271   : > { %v1223_v20 = vpop.f32.mrf.mxu1 }
 0x272   : > { %v1224_v21 = vadd.f32 %v1223_v20, %v4806_v25  ;;  %v1305_v31 = vmax.f32 %v1271_v24, 0.0 }
 0x274   : > { %v1306_v22 = vmax.f32 %v1224_v21, 0.0 }
 0x276   : > { %v1324_v7 = vpack.c.bf16 %v1306_v22, %v1304_v52 }
 0x277   : > { %v1272_v26 = vpop.f32.mrf.mxu2 }
 0x278   : > { %v1273_v27 = vadd.f32 %v1272_v26, %v4809_v30  ;;  %1558 = vmatmul.bf16.gmra.mxu3 %v1324_v7  ;;  %1656 = vmatmul.bf16.gmra.mxu2 %v1324_v7 }
 0x279   : > { %v1226_v29 = vpop.f32.mrf.mxu1 }
 0x27a   : > { %v1307_v32 = vmax.f32 %v1273_v27, 0.0  ;;  %v1227_v11 = vadd.f32 %v1226_v29, %v4806_v25 }
 0x27c   : > { %v1325_v33 = vpack.c.bf16 %v1307_v32, %v1305_v31  ;;  %v1308_v39 = vmax.f32 %v1227_v11, 0.0 }
 0x27e   : > { %1607 = vmatmul.bf16.gmra.mxu1 %v1325_v33  ;;  %1705 = vmatmul.bf16.gmra.mxu0 %v1325_v33 }
 0x27f   : > { %v1275_v34 = vpop.f32.mrf.mxu2 }
 0x280   : > { %v1276_v41 = vadd.f32 %v1275_v34, %v4809_v30 }
 0x281   : > { %v1228_v37 = vpop.f32.mrf.mxu1 }
 0x282   : > { %v1229_v38 = vadd.f32 %v1228_v37, %v4806_v25  ;;  %v1309_v8 = vmax.f32 %v1276_v41, 0.0 }
 0x284   : > { %v1310_v35 = vmax.f32 %v1229_v38, 0.0 }
 0x286   : > { %v1326_v42 = vpack.c.bf16 %v1310_v35, %v1308_v39 }
 0x287   : > { %v1277_v43 = vpop.f32.mrf.mxu2 }
 0x288   : > { %v1278_v46 = vadd.f32 %v1277_v43, %v4809_v30  ;;  %1563 = vmatmul.bf16.gmra.mxu3 %v1326_v42  ;;  %1661 = vmatmul.bf16.gmra.mxu2 %v1326_v42 }
 0x28a   : > { %v1311_v49 = vmax.f32 %v1278_v46, 0.0 }
 0x28c   : > { %v1327_v50 = vpack.c.bf16 %v1311_v49, %v1309_v8 }
 0x28e   : > { %1612 = vmatmul.bf16.gmra.mxu1 %v1327_v50  ;;  %1710 = vmatmul.bf16.gmra.mxu0 %v1327_v50 }
 0x29b   : > { %v1529_v51 = vpop.f32.mrf.mxu3  ;;  %v1578_v54 = vpop.f32.mrf.mxu1 }
 0x29c   : > { %v4842_v56 = vadd.f32 %v1578_v54, %v1529_v51  ;;  %v1627_v25 = vpop.f32.mrf.mxu2  ;;  %v1676_v44 = vpop.f32.mrf.mxu0 }
 0x29d   : > { %v4844_v57 = vadd.f32 %v1676_v44, %v1627_v25 }
 0x29e   : > { %5247 = vst [vmem:[#allocation18_spill] sm:$0xff] %v4842_v56 }
 0x29f   : > { %5248 = vst [vmem:[#allocation19_spill] sm:$0xff] %v4844_v57 }
 0x2a3   : > { %v4846_v58 = vpop.f32.mrf.mxu3  ;;  %v4848_v60 = vpop.f32.mrf.mxu1 }
 0x2a4   : > { %5249 = vst [vmem:[#allocation20_spill] sm:$0xff] %v4846_v58  ;;  %v4850_v30 = vpop.f32.mrf.mxu2  ;;  %v4852_v61 = vpop.f32.mrf.mxu0 }
 0x2a5   : > { %5250 = vst [vmem:[#allocation21_spill] sm:$0xff] %v4848_v60 }
 0x2a6   : > { %5251 = vst [vmem:[#allocation22_spill] sm:$0xff] %v4850_v30 }
 0x2a7   : > { %5252 = vst [vmem:[#allocation23_spill] sm:$0xff] %v4852_v61 }
 0x2ab   : > { %v1534_v47 = vpop.f32.mrf.mxu3  ;;  %v1583_v63 = vpop.f32.mrf.mxu1 }
 0x2ac   : > { %v4854_v45 = vadd.f32 %v1583_v63, %v1534_v47  ;;  %v1632_v2 = vpop.f32.mrf.mxu2  ;;  %v1681_v48 = vpop.f32.mrf.mxu0 }
 0x2ad   : > { %v4856_v0 = vadd.f32 %v1681_v48, %v1632_v2 }
 0x2ae   : > { %5253 = vst [vmem:[#allocation24_spill] sm:$0xff] %v4854_v45 }
 0x2af   : > { %5254 = vst [vmem:[#allocation25_spill] sm:$0xff] %v4856_v0 }
 0x2b3   : > { %v4858_v4 = vpop.f32.mrf.mxu3  ;;  %v4860_v5 = vpop.f32.mrf.mxu1 }
 0x2b4   : > { %v4862_v6 = vpop.f32.mrf.mxu2  ;;  %v4864_v12 = vpop.f32.mrf.mxu0 }
 0x2bb   : > { %v1539_v15 = vpop.f32.mrf.mxu3  ;;  %v1588_v16 = vpop.f32.mrf.mxu1 }
 0x2bc   : > { %v4866_v17 = vadd.f32 %v1588_v16, %v1539_v15  ;;  %v1637_v20 = vpop.f32.mrf.mxu2  ;;  %v1686_v21 = vpop.f32.mrf.mxu0 }
 0x2bd   : > { %v1687_v52 = vadd.f32 %v1686_v21, %v1637_v20 }
 0x2bf   : > { %v4873_v29 = vmul.f32 %v1687_v52, %v4541_v40 }
 0x2c1   : > { %5255 = vst [vmem:[#allocation26_spill] sm:$0xff] %v4873_v29 }
 0x2c3   : > { %v4868_v22 = vpop.f32.mrf.mxu3  ;;  %v4870_v24 = vpop.f32.mrf.mxu1 }
 0x2c4   : > { %v1639_v7 = vpop.f32.mrf.mxu2  ;;  %v1688_v26 = vpop.f32.mrf.mxu0 }
 0x2c5   : > { %v1689_v27 = vadd.f32 %v1688_v26, %v1639_v7 }
 0x2c7   : > { %v4876_v31 = vmul.f32 %v1689_v27, %v4528_v28 }
 0x2c9   : > { %5256 = vst [vmem:[#allocation27_spill] sm:$0xff] %v4876_v31 }
 0x2cb   : > { %v1544_v33 = vpop.f32.mrf.mxu3  ;;  %v1593_v34 = vpop.f32.mrf.mxu1 }
 0x2cc   : > { %v4880_v11 = vadd.f32 %v1593_v34, %v1544_v33  ;;  %v1642_v37 = vpop.f32.mrf.mxu2  ;;  %v1691_v38 = vpop.f32.mrf.mxu0 }
 0x2cd   : > { %v1692_v39 = vadd.f32 %v1691_v38, %v1642_v37 }
 0x2cf   : > { %v4887_v8 = vmul.f32 %v1692_v39, %v4503_v13 }
 0x2d1   : > { %5257 = vst [vmem:[#allocation28_spill] sm:$0xff] %v4887_v8 }
 0x2d3   : > { %v4882_v35 = vpop.f32.mrf.mxu3  ;;  %v4884_v41 = vpop.f32.mrf.mxu1 }
 0x2d4   : > { %v1644_v42 = vpop.f32.mrf.mxu2  ;;  %v1693_v43 = vpop.f32.mrf.mxu0 }
 0x2d5   : > { %v1694_v46 = vadd.f32 %v1693_v43, %v1644_v42 }
 0x2d7   : > { %v4890_v49 = vmul.f32 %v1694_v46, %v4520_v18 }
 0x2d9   : > { %5258 = vst [vmem:[#allocation29_spill] sm:$0xff] %v4890_v49 }
 0x2db   : > { %v1549_v51 = vpop.f32.mrf.mxu3  ;;  %v1598_v54 = vpop.f32.mrf.mxu1 }
 0x2dc   : > { %v4894_v25 = vadd.f32 %v1598_v54, %v1549_v51  ;;  %v1647_v44 = vpop.f32.mrf.mxu2  ;;  %v1696_v47 = vpop.f32.mrf.mxu0 }
 0x2dd   : > { %v4896_v63 = vadd.f32 %v1696_v47, %v1647_v44 }
 0x2e3   : > { %v1551_v2 = vpop.f32.mrf.mxu3  ;;  %v1600_v48 = vpop.f32.mrf.mxu1 }
 0x2e4   : > { %v1649_v15 = vpop.f32.mrf.mxu2  ;;  %v1698_v16 = vpop.f32.mrf.mxu0 }
 0x2eb   : > { %v1554_v20 = vpop.f32.mrf.mxu3  ;;  %v1603_v21 = vpop.f32.mrf.mxu1 }
 0x2ec   : > { %v1652_v52 = vpop.f32.mrf.mxu2  ;;  %v1701_v7 = vpop.f32.mrf.mxu0 }
 0x2f3   : > { %v1556_v26 = vpop.f32.mrf.mxu3  ;;  %v1605_v27 = vpop.f32.mrf.mxu1 }
 0x2f4   : > { %v1654_v33 = vpop.f32.mrf.mxu2  ;;  %v1703_v34 = vpop.f32.mrf.mxu0 }
 0x2fb   : > { %v1559_v37 = vpop.f32.mrf.mxu3  ;;  %v1608_v38 = vpop.f32.mrf.mxu1 }
 0x2fc   : > { %v1657_v39 = vpop.f32.mrf.mxu2  ;;  %v1706_v42 = vpop.f32.mrf.mxu0  ;;  %v1609_v30 = vadd.f32 %v1608_v38, %v1559_v37 }
 0x2fd   : > { %v1707_v58 = vadd.f32 %v1706_v42, %v1657_v39  ;;  %v5264_v39 = vld [vmem:[#allocation14_spill] sm:$0xff]  ;;  %v5266_v42 = vld [vmem:[#allocation23_spill] sm:$0xff] }
 0x303   : > { %v1561_v43 = vpop.f32.mrf.mxu3  ;;  %v1610_v46 = vpop.f32.mrf.mxu1 }
 0x304   : > { %v1659_v51 = vpop.f32.mrf.mxu2  ;;  %v1708_v54 = vpop.f32.mrf.mxu0  ;;  %v1611_v29 = vadd.f32 %v1610_v46, %v1561_v43  ;;  %v1704_v43 = vadd.f32 %v1703_v34, %v1654_v33  ;;  %v1604_v46 = vadd.f32 %v1603_v21, %v1554_v20  ;;  %v1728_v21 = vmul.f32 %v4880_v11, %v4503_v13  ;;  %v5262_v11 = vld [vmem:[#allocation20_spill] sm:$0xff]  ;;  %v5263_v34 = vld [vmem:[#allocation21_spill] sm:$0xff] }
 0x305   : > { %v1709_v62 = vadd.f32 %v1708_v54, %v1659_v51  ;;  %v1581_v37 = vadd.f32 %v5263_v34, %v5262_v11 }
 0x30b   : > { %v1564_v44 = vpop.f32.mrf.mxu3  ;;  %v1613_v47 = vpop.f32.mrf.mxu1 }
 0x30c   : > { %v1662_v32 = vpop.f32.mrf.mxu2  ;;  %v1711_v50 = vpop.f32.mrf.mxu0  ;;  %v1614_v57 = vadd.f32 %v1613_v47, %v1564_v44  ;;  %v1606_v44 = vadd.f32 %v1605_v27, %v1556_v26  ;;  %v1699_v26 = vadd.f32 %v1698_v16, %v1649_v15  ;;  %v1733_v15 = vmul.f32 %v4896_v63, %v4488_v1  ;;  %v5260_v27 = vld [vmem:[#allocation28_spill] sm:$0xff] }
 0x30d   : > { %v1712_v56 = vadd.f32 %v1711_v50, %v1662_v32  ;;  %v1742_v32 = vmul.f32 %v1611_v29, %v4420_v23  ;;  %v1739_v29 = vmul.f32 %v1704_v43, %v4443_v36  ;;  %v1591_v16 = vadd.f32 %v4870_v24, %v4868_v22  ;;  %v5259_v24 = vld [vmem:[#allocation29_spill] sm:$0xff] }
 0x30e   : > { %v1744_v55 = vmul.f32 %v1614_v57, %v4368_v3  ;;  %v1702_v57 = vadd.f32 %v1701_v7, %v1652_v52  ;;  %v1684_v63 = vadd.f32 %v4864_v12, %v4862_v6  ;;  %v1724_v22 = vmul.f32 %v4866_v17, %v4541_v40  ;;  %v5267_v6 = vld [vmem:[#allocation15_spill] sm:$0xff]  ;;  %v5268_v12 = vld [vmem:[#allocation24_spill] sm:$0xff]  ;;  %v5269_v17 = vld [vmem:[#allocation25_spill] sm:$0xff] }
 0x30f   : > { %v1745_v8 = vmul.f32 %v1712_v56, %v4368_v3  ;;  %v1738_v56 = vmul.f32 %v1606_v44, %v4443_v36  ;;  %v1726_v7 = vmul.f32 %v1591_v16, %v4528_v28  ;;  %v5261_v33 = vpack.c.bf16 %v5259_v24, %v5260_v27  ;;  %v3850_v16 = vld [vmem:[%s4264_s28 + $0x38] sm:$0xff] }
 0x310   : > { %v1723_v54 = vmul.f32 %v1684_v63, %v5264_v39  ;;  %v1720_v47 = vmul.f32 %v5268_v12, %v5267_v6  ;;  %v1721_v44 = vmul.f32 %v5269_v17, %v5267_v6 }
 0x311   : > { %v1752_v38 = vpack.c.bf16 %v1726_v7, %v1724_v22  ;;  %v1894_v7 = vld [vmem:[%s5194_s7] sm:$0x3] }
 0x312   : > { %v4975_v22 = vperm.slane %v1894_v7, 1 }
 0x313   : > { %v1566_v53 = vpop.f32.mrf.mxu3  ;;  %v1615_v10 = vpop.f32.mrf.mxu1 }
 0x314   : > { %v1616_v31 = vadd.f32 %v1615_v10, %v1566_v53  ;;  %v1664_v0 = vpop.f32.mrf.mxu2  ;;  %v1713_v45 = vpop.f32.mrf.mxu0  ;;  %v1743_v53 = vmul.f32 %v1709_v62, %v4420_v23  ;;  %v1737_v62 = vmul.f32 %v1702_v57, %v4408_v19  ;;  %v1751_v57 = vpack.c.bf16 %v1723_v54, %v1721_v44 }
 0x315   : > { %v1714_v61 = vadd.f32 %v1713_v45, %v1664_v0  ;;  %v1740_v45 = vmul.f32 %v1609_v30, %v4381_v9  ;;  %v1741_v0 = vmul.f32 %v1707_v58, %v4381_v9  ;;  %v1596_v30 = vadd.f32 %v4884_v41, %v4882_v35 }
 0x316   : > { %v1746_v60 = vmul.f32 %v1616_v31, %v4398_v14  ;;  %v1601_v31 = vadd.f32 %v1600_v48, %v1551_v2  ;;  %v1759_v2 = vpack.c.bf16 %v1739_v29, %v1737_v62  ;;  %v1732_v48 = vmul.f32 %v4894_v25, %v4488_v1  ;;  %v3844_v62 = vld [vmem:[%s4264_s28 + $0x8] sm:$0xff] }
 0x317   : > { %v1747_v49 = vmul.f32 %v1714_v61, %v4398_v14  ;;  %v1760_v61 = vpack.c.bf16 %v1742_v32, %v1740_v45  ;;  %v1730_v35 = vmul.f32 %v1596_v30, %v4520_v18  ;;  %v1586_v25 = vadd.f32 %v4860_v5, %v4858_v4  ;;  %v5265_v5 = vld [vmem:[#allocation22_spill] sm:$0xff]  ;;  %v5270_v32 = vld [vmem:[#allocation27_spill] sm:$0xff]  ;;  %v3845_v30 = vld [vmem:[%s4264_s28 + $0x10] sm:$0xff] }
 0x318   : > { %v1762_v50 = vpack.c.bf16 %v1746_v60, %v1744_v55  ;;  %v1761_v55 = vpack.c.bf16 %v1743_v53, %v1741_v0  ;;  %v1736_v60 = vmul.f32 %v1604_v46, %v4408_v19  ;;  %v1734_v58 = vmul.f32 %v1601_v31, %v4476_v59  ;;  %v5274_v0 = vld [vmem:[#allocation16_spill] sm:$0xff]  ;;  %v5275_v31 = vld [vmem:[#allocation18_spill] sm:$0xff] }
 0x319   : > { %v1763_v10 = vpack.c.bf16 %v1747_v49, %v1745_v8  ;;  %v1735_v49 = vmul.f32 %v1699_v26, %v4476_v59  ;;  %v1754_v52 = vpack.c.bf16 %v1730_v35, %v1728_v21  ;;  %v1722_v4 = vmul.f32 %v1586_v25, %v5264_v39 }
 0x31a   : > { %1764 = vmatpush.bf16.msrb.mxu3 %v1762_v50  ;;  %v1758_v8 = vpack.c.bf16 %v1738_v56, %v1736_v60  ;;  %v1756_v20 = vpack.c.bf16 %v1734_v58, %v1732_v48  ;;  %v1679_v51 = vadd.f32 %v5266_v42, %v5265_v5  ;;  %v5271_v50 = vld [vmem:[#allocation26_spill] sm:$0xff]  ;;  %v1716_v56 = vmul.f32 %v5275_v31, %v5274_v0 }
 0x31b   : > { %1813 = vmatpush.bf16.msra.mxu1 %v1763_v10  ;;  %v1757_v41 = vpack.c.bf16 %v1735_v49, %v1733_v15  ;;  %v5272_v43 = vpack.c.bf16 %v5270_v32, %v5271_v50  ;;  %v1750_v53 = vpack.c.bf16 %v1722_v4, %v1720_v47  ;;  %v5273_v10 = vld [vmem:[#allocation17_spill] sm:$0xff]  ;;  %v3843_v60 = vld [vmem:[%s4264_s28] sm:$0xff]  ;;  %v3848_v49 = vld [vmem:[%s4264_s28 + $0x28] sm:$0xff]  ;;  %v1965_v48 = vlaneseq }
 0x31c   : > { %v1718_v46 = vmul.f32 %v1581_v37, %v5273_v10  ;;  %v1719_v45 = vmul.f32 %v1679_v51, %v5273_v10  ;;  %v3847_v58 = vld [vmem:[%s4264_s28 + $0x20] sm:$0xff] }
 0x31d   : > { %v1966_v15 = vshrl.u32 %v1965_v48, 7 }
 0x31e   : > { %1765 = vmatpush.bf16.msrb.mxu3 %v1760_v61  ;;  %v5276_v61 = vld [vmem:[#allocation19_spill] sm:$0xff]  ;;  %v1748_v29 = vpack.c.bf16 %v1718_v46, %v1716_v56 }
 0x31f   : > { %1814 = vmatpush.bf16.msra.mxu1 %v1761_v55  ;;  %v1717_v26 = vmul.f32 %v5276_v61, %v5274_v0  ;;  %v1967_v35 = vadd.s32 8, %v1966_v15 }
 0x321   : > { %v1749_v55 = vpack.c.bf16 %v1719_v45, %v1717_v26 }
 0x322   : > { %1766 = vmatpush.bf16.msrb.mxu3 %v1758_v8  ;;  %v3846_v8 = vld [vmem:[%s4264_s28 + $0x18] sm:$0xff] }
 0x323   : > { %1815 = vmatpush.bf16.msra.mxu1 %v1759_v2  ;;  %v3849_v2 = vld [vmem:[%s4264_s28 + $0x30] sm:$0xff]  ;;  %s3050_s28 = sshll.u32 %s4176_s18, 1 }
 0x324   : > { %p743_p5 = scmp.lt.s32.totalorder %s3050_s28, 3 }
 0x326   : > { %1767 = vmatpush.bf16.msrb.mxu3 %v1756_v20  ;;  %v3802_v20 = vld [vmem:[%s741_s27] ss:$0 sm:$0xff]  ;;  %s5293_s28 = smov (!%p743_p5, %s3050_s28), 3  ;;  %s5283_s27 = sld [smem:[#allocation37_spill]] }
 0x327   : > { %1816 = vmatpush.bf16.msra.mxu1 %v1757_v41  ;;  %vm1969_vm2 = vcmp.eq.s32.totalorder %v1966_v15, %v3802_v20  ;;  %vm1970_vm3 = vcmp.eq.s32.totalorder %v1967_v35, %v3802_v20  ;;  %v4053_v41 = vmov 0.0   ;;  %v5011_v20 = vperm.slane %v1894_v7, 0  ;;  %s3588_s12 = sshll.u32 %s5293_s28, 4  ;;  %s3054_s18 = sshll.u32 %s5293_s28, 3 }
 0x328   : > { %v4965_v21 = vsel %vm1969_vm2, 1.0, %v4053_v41  ;;  %v4967_v25 = vsel %vm1970_vm3, 1.0, %v4053_v41  ;;  %s747_s22 = scalar_lea.vmem %s5282_s26, %s3588_s12  ;;  %s5284_s12 = sld [smem:[#allocation38_spill]] }
 0x329   : > { %1975 = vadd.xlane.f32.xlu1 %v4965_v21  ;;  %1977 = vadd.xlane.f32.xlu2 %v4967_v25 }
 0x32a   : > { %1768 = vmatpush.bf16.msrb.mxu3 %v1754_v52 }
 0x32b   : > { %1817 = vmatpush.bf16.msra.mxu1 %v5261_v33 }
 0x32e   : > { %1769 = vmatpush.bf16.msrb.mxu3 %v1752_v38 }
 0x32f   : > { %1818 = vmatpush.bf16.msra.mxu1 %v5272_v43 }
 0x332   : > { %1770 = vmatpush.bf16.msrb.mxu3 %v1750_v53 }
 0x333   : > { %1819 = vmatpush.bf16.msra.mxu1 %v1751_v57 }
 0x336   : > { %1771 = vmatpush.bf16.msrb.mxu3 %v1748_v29 }
 0x337   : > { %1820 = vmatpush.bf16.msra.mxu1 %v1749_v55 }
 0x339   : > { %1772 = vmatmul.bf16.vlgmr.msrb.gmra.mxu3 %v3843_v60 }
 0x33a   : > { %1821 = vmatmul.bf16.vlgmr.msra.gmra.mxu1 %v3843_v60 }
 0x349   : > { %1777 = vmatmul.bf16.gmra.mxu3 %v3844_v62 }
 0x34a   : > { %1826 = vmatmul.bf16.gmra.mxu1 %v3844_v62 }
 0x359   : > { %1782 = vmatmul.bf16.gmra.mxu3 %v3845_v30 }
 0x35a   : > { %1831 = vmatmul.bf16.gmra.mxu1 %v3845_v30 }
 0x369   : > { %1787 = vmatmul.bf16.gmra.mxu3 %v3846_v8 }
 0x36a   : > { %1836 = vmatmul.bf16.gmra.mxu1 %v3846_v8 }
 0x379   : > { %1792 = vmatmul.bf16.gmra.mxu3 %v3847_v58 }
 0x37a   : > { %1841 = vmatmul.bf16.gmra.mxu1 %v3847_v58 }
 0x389   : > { %1797 = vmatmul.bf16.gmra.mxu3 %v3848_v49 }
 0x38a   : > { %1846 = vmatmul.bf16.gmra.mxu1 %v3848_v49 }
 0x399   : > { %1802 = vmatmul.bf16.gmra.mxu3 %v3849_v2 }
 0x39a   : > { %1851 = vmatmul.bf16.gmra.mxu1 %v3849_v2 }
 0x3a9   : > { %1807 = vmatmul.bf16.gmra.mxu3 %v3850_v16 }
 0x3aa   : > { %1856 = vmatmul.bf16.gmra.mxu1 %v3850_v16 }
 0x3b7   : > { %v1822_v52 = vpop.f32.mrf.mxu1 }
 0x3b8   : > { %v1863_v63 = vmul.f32 %v1822_v52, %v5274_v0 }
 0x3ba   : > { %v1901_v33 = vadd.f32 %v4975_v22, %v1863_v63 }
 0x3bc   : > { %v4977_v24 = vpop.f32.mrf.mxu3  ;;  %v1933_v37 = vmax.f32 %v1901_v33, 0.0 }
 0x3bf   : > { %v1824_v27 = vpop.f32.mrf.mxu1 }
 0x3c0   : > { %v1865_v11 = vmul.f32 %v1824_v27, %v5273_v10 }
 0x3c2   : > { %v1903_v34 = vadd.f32 %v4975_v22, %v1865_v11 }
 0x3c4   : > { %v1935_v38 = vmax.f32 %v1903_v34, 0.0  ;;  %v4982_v4 = vpop.f32.mrf.mxu3 }
 0x3c6   : > { %v4984_v5 = vpack.c.bf16 %v1935_v38, %v1933_v37 }
 0x3c7   : > { %v1827_v42 = vpop.f32.mrf.mxu1 }
 0x3c8   : > { %v1867_v51 = vmul.f32 %v1827_v42, %v5267_v6 }
 0x3ca   : > { %v1905_v47 = vadd.f32 %v4975_v22, %v1867_v51 }
 0x3cc   : > { %v4987_v54 = vpop.f32.mrf.mxu3  ;;  %v1937_v32 = vmax.f32 %v1905_v47, 0.0 }
 0x3cf   : > { %v1829_v12 = vpop.f32.mrf.mxu1 }
 0x3d0   : > { %v1869_v17 = vmul.f32 %v1829_v12, %v5264_v39 }
 0x3d2   : > { %v1907_v44 = vadd.f32 %v4975_v22, %v1869_v17 }
 0x3d4   : > { %v1939_v50 = vmax.f32 %v1907_v44, 0.0  ;;  %v4992_v43 = vpop.f32.mrf.mxu3 }
 0x3d6   : > { %v4994_v53 = vpack.c.bf16 %v1939_v50, %v1937_v32 }
 0x3d7   : > { %v1832_v46 = vpop.f32.mrf.mxu1 }
 0x3d8   : > { %v1871_v45 = vmul.f32 %v1832_v46, %v4541_v40 }
 0x3da   : > { %v1909_v56 = vadd.f32 %v4975_v22, %v1871_v45 }
 0x3dc   : > { %v4997_v57 = vpop.f32.mrf.mxu3  ;;  %v1941_v29 = vmax.f32 %v1909_v56, 0.0  ;;  %v1978_v56 = vpop.xlane.xlu2 %1977 }
 0x3df   : > { %v1834_v31 = vpop.f32.mrf.mxu1 }
 0x3e0   : > { %v1873_v61 = vmul.f32 %v1834_v31, %v4528_v28  ;;  %v1976_v31 = vpop.xlane.xlu1 %1975 }
 0x3e2   : > { %v1911_v26 = vadd.f32 %v4975_v22, %v1873_v61 }
 0x3e4   : > { %v1943_v55 = vmax.f32 %v1911_v26, 0.0  ;;  %v5002_v60 = vpop.f32.mrf.mxu3 }
 0x3e6   : > { %v5004_v62 = vpack.c.bf16 %v1943_v55, %v1941_v29  ;;  %v5023_v29 = vmax.f32 %v1976_v31, 1.0 }
 0x3e7   : > { %v1837_v30 = vpop.f32.mrf.mxu1 }
 0x3e8   : > { %v1875_v8 = vmul.f32 %v1837_v30, %v4503_v13  ;;  %v5026_v30 = vmax.f32 %v1978_v56, 1.0  ;;  %3839 = vrcp.f32 %v5023_v29  ;;  %vm1986_vm4 = vweird.f32 %v5023_v29 }
 0x3ea   : > { %v1913_v2 = vadd.f32 %v4975_v22, %v1875_v8  ;;  %3841 = vrcp.f32 %v5026_v30  ;;  %vm2001_vm6 = vweird.f32 %v5026_v30 }
 0x3ec   : > { %v1788_v58 = vpop.f32.mrf.mxu3  ;;  %v1945_v35 = vmax.f32 %v1913_v2, 0.0 }
 0x3ed   : > { %v1874_v15 = vmul.f32 %v1788_v58, %v4503_v13 }
 0x3ef   : > { %v1839_v49 = vpop.f32.mrf.mxu1  ;;  %v1912_v63 = vadd.f32 %v5011_v20, %v1874_v15 }
 0x3f0   : > { %v1877_v48 = vmul.f32 %v1839_v49, %v4520_v18 }
 0x3f1   : > { %v1944_v37 = vmax.f32 %v1912_v63, 0.0 }
 0x3f2   : > { %v1915_v16 = vadd.f32 %v4975_v22, %v1877_v48 }
 0x3f4   : > { %v1947_v41 = vmax.f32 %v1915_v16, 0.0  ;;  %v1790_v52 = vpop.f32.mrf.mxu3 }
 0x3f5   : > { %v1876_v27 = vmul.f32 %v1790_v52, %v4520_v18 }
 0x3f6   : > { %v5015_v33 = vpack.c.bf16 %v1947_v41, %v1945_v35 }
 0x3f7   : > { %v1914_v11 = vadd.f32 %v5011_v20, %v1876_v27  ;;  %v1842_v34 = vpop.f32.mrf.mxu1 }
 0x3f9   : > { %v1946_v38 = vmax.f32 %v1914_v11, 0.0 }
 0x3fb   : > { %v5018_v42 = vpack.c.bf16 %v1946_v38, %v1944_v37 }
 0x3fc   : > { %v5020_v13 = vpop.f32.mrf.mxu3 }
 0x3ff   : > { %v1844_v7 = vpop.f32.mrf.mxu1 }
 0x400   : > { %v1881_v41 = vmul.f32 %v1844_v7, %v4476_v59 }
 0x404   : > { %v1795_v51 = vpop.f32.mrf.mxu3 }
 0x407   : > { %v1847_v12 = vpop.f32.mrf.mxu1 }
 0x408   : > { %v1883_v63 = vmul.f32 %v1847_v12, %v4408_v19 }
 0x40c   : > { %v1798_v47 = vpop.f32.mrf.mxu3 }
 0x40f   : > { %v1849_v17 = vpop.f32.mrf.mxu1 }
 0x410   : > { %v1885_v15 = vmul.f32 %v1849_v17, %v4443_v36 }
 0x414   : > { %v1800_v44 = vpop.f32.mrf.mxu3 }
 0x417   : > { %v1852_v32 = vpop.f32.mrf.mxu1 }
 0x418   : > { %v1887_v58 = vmul.f32 %v1852_v32, %v4381_v9 }
 0x41a   : > { %v1925_v27 = vadd.f32 %v4975_v22, %v1887_v58 }
 0x41c   : > { %v1803_v50 = vpop.f32.mrf.mxu3 }
 0x41d   : > { %v1886_v38 = vmul.f32 %v1803_v50, %v4381_v9  ;;  %v1879_v9 = vmul.f32 %v1842_v34, %v4488_v1  ;;  %v1919_v50 = vadd.f32 %v4975_v22, %v1881_v41 }
 0x41f   : > { %v1854_v18 = vpop.f32.mrf.mxu1 }
 0x420   : > { %v1889_v55 = vmul.f32 %v1854_v18, %v4420_v23  ;;  %v1923_v18 = vadd.f32 %v4975_v22, %v1885_v15 }
 0x422   : > { %v1927_v16 = vadd.f32 %v4975_v22, %v1889_v55  ;;  %v1955_v58 = vmax.f32 %v1923_v18, 0.0 }
 0x424   : > { %v1805_v46 = vpop.f32.mrf.mxu3  ;;  %v1959_v7 = vmax.f32 %v1927_v16, 0.0 }
 0x425   : > { %v1888_v52 = vmul.f32 %v1805_v46, %v4420_v23  ;;  %v5046_v23 = vpop.eup %3839 }
 0x426   : > { %v5050_v56 = vpop.eup %3841  ;;  %v1982_v15 = vmul.f32 %v5046_v23, %v5023_v29  ;;  %vm1987_vm5 = vweird.f32 %v5046_v23 }
 0x427   : > { %v1857_v45 = vpop.f32.mrf.mxu1  ;;  %v1926_v12 = vadd.f32 %v5011_v20, %v1888_v52  ;;  %v1997_v16 = vmul.f32 %v5050_v56, %v5026_v30  ;;  %vm2002_vm7 = vweird.f32 %v5050_v56  ;;  %vm5086_vm8 = vmor %vm1986_vm4, %vm1987_vm5 }
 0x428   : > { %v1891_v61 = vmul.f32 %v1857_v45, %v4368_v3  ;;  %v1884_v45 = vmul.f32 %v1800_v44, %v4443_v36  ;;  %v1882_v36 = vmul.f32 %v1798_v47, %v4408_v19  ;;  %v1924_v44 = vadd.f32 %v5011_v20, %v1886_v38  ;;  %vm5092_vm9 = vmor %vm2001_vm6, %vm2002_vm7 }
 0x429   : > { %v1917_v19 = vadd.f32 %v4975_v22, %v1879_v9  ;;  %v1878_v47 = vmul.f32 %v5020_v13, %v4488_v1  ;;  %v1998_v18 = vsub.f32 1.0, %v1997_v16  ;;  %v3243_v16 = vld [vmem:[#allocation5 + $0x10] sm:$0xf] }
 0x42a   : > { %v1929_v49 = vadd.f32 %v4975_v22, %v1891_v61  ;;  %v1957_v61 = vmax.f32 %v1925_v27, 0.0  ;;  %v1920_v41 = vadd.f32 %v5011_v20, %v1882_v36  ;;  %v1956_v52 = vmax.f32 %v1924_v44, 0.0  ;;  %v3283_v27 = vld [vmem:[#allocation5 + $0x60] sm:$0xf] }
 0x42b   : > { %v1949_v13 = vmax.f32 %v1917_v19, 0.0  ;;  %v3636_v19 = vld [vmem:[#allocation5 + $0x34] sm:$0xf0] }
 0x42c   : > { %v1808_v26 = vpop.f32.mrf.mxu3  ;;  %v1961_v11 = vmax.f32 %v1929_v49, 0.0  ;;  %v1922_v49 = vadd.f32 %v5011_v20, %v1884_v45  ;;  %v1916_v45 = vadd.f32 %v5011_v20, %v1878_v47  ;;  %v1864_v47 = vmul.f32 %v4982_v4, %v5273_v10 }
 0x42d   : > { %v1890_v48 = vmul.f32 %v1808_v26, %v4368_v3  ;;  %v1862_v4 = vmul.f32 %v4977_v24, %v5274_v0 }
 0x42e   : > { %v1954_v38 = vmax.f32 %v1922_v49, 0.0  ;;  %v2007_v49 = vand.u32 2147483648, %v5026_v30 }
 0x42f   : > { %v1859_v8 = vpop.f32.mrf.mxu1  ;;  %v1928_v17 = vadd.f32 %v5011_v20, %v1890_v48  ;;  %v1958_v48 = vmax.f32 %v1926_v12, 0.0  ;;  %v1872_v12 = vmul.f32 %v5002_v60, %v4528_v28  ;;  %v3267_v28 = vld [vmem:[#allocation5 + $0x40] sm:$0xf]  ;;  %v3638_v60 = vld [vmem:[#allocation5 + $0x44] sm:$0xf0] }
 0x430   : > { %v1893_v2 = vmul.f32 %v1859_v8, %v4398_v14  ;;  %v1880_v8 = vmul.f32 %v1795_v51, %v4476_v59  ;;  %v3291_v59 = vld [vmem:[#allocation5 + $0x70] sm:$0xf]  ;;  %v3644_v51 = vld [vmem:[#allocation5 + $0x74] sm:$0xf0] }
 0x431   : > { %v1960_v26 = vmax.f32 %v1928_v17, 0.0 }
 0x432   : > { %v1931_v35 = vadd.f32 %v4975_v22, %v1893_v2  ;;  %v2025_v2 = vpack.c.bf16 %v1959_v7, %v1957_v61  ;;  %v3275_v7 = vld [vmem:[#allocation5 + $0x50] sm:$0xf]  ;;  %v1999_v61 = vmul.f32 %v5050_v56, %v1998_v18 }
 0x434   : > { %v1963_v3 = vmax.f32 %v1931_v35, 0.0  ;;  %v1810_v37 = vpop.f32.mrf.mxu3 }
 0x435   : > { %v1892_v32 = vmul.f32 %v1810_v37, %v4398_v14  ;;  %v1921_v14 = vadd.f32 %v4975_v22, %v1883_v63  ;;  %v3292_v63 = vor.u32 %v3644_v51, %v3291_v59  ;;  %v1918_v37 = vadd.f32 %v5011_v20, %v1880_v8 }
 0x436   : > { %v2027_v31 = vpack.c.bf16 %v1963_v3, %v1961_v11  ;;  %v3642_v11 = vld [vmem:[#allocation5 + $0x64] sm:$0xf0]  ;;  %v1951_v3 = vmax.f32 %v1919_v50, 0.0  ;;  %v2024_v22 = vpack.c.bf16 %v1958_v48, %v1956_v52  ;;  %v1870_v8 = vmul.f32 %v4997_v57, %v4541_v40 }
 0x437   : > { %v1930_v46 = vadd.f32 %v5011_v20, %v1892_v32  ;;  %v1953_v35 = vmax.f32 %v1921_v14, 0.0  ;;  %v1983_v32 = vsub.f32 1.0, %v1982_v15  ;;  %2262 = vmatpush.bf16.msra.mxu3 %v3292_v63  ;;  %v3284_v1 = vor.u32 %v3642_v11, %v3283_v27 }
 0x438   : > { %2042 = vmatpush.bf16.msra.mxu0 %v2027_v31  ;;  %v3640_v31 = vld [vmem:[#allocation5 + $0x54] sm:$0xf0]  ;;  %v1950_v9 = vmax.f32 %v1918_v37, 0.0  ;;  %v2021_v50 = vpack.c.bf16 %v1951_v3, %v1949_v13  ;;  %v2000_v40 = vadd.f32 %v5050_v56, %v1999_v61  ;;  %v2005_v57 = vand.u32 2147483647, %v5026_v30 }
 0x439   : > { %v1962_v55 = vmax.f32 %v1930_v46, 0.0  ;;  %v2023_v17 = vpack.c.bf16 %v1955_v58, %v1953_v35  ;;  %v1952_v46 = vmax.f32 %v1920_v41, 0.0  ;;  %v1984_v14 = vmul.f32 %v5046_v23, %v1983_v32  ;;  %v3293_v61 = vld [vmem:[#allocation5 + $0x78] sm:$0xf0] }
 0x43a   : > { %v3276_v44 = vor.u32 %v3640_v31, %v3275_v7  ;;  %v1910_v58 = vadd.f32 %v5011_v20, %v1872_v12  ;;  %v3268_v15 = vor.u32 %v3638_v60, %v3267_v28  ;;  %v1866_v35 = vmul.f32 %v4987_v54, %v5267_v6  ;;  %v3656_v7 = vld [vmem:[#allocation5 + $0xd4] sm:$0xf0]  ;;  %v3331_v31 = vld [vmem:[#allocation5 + $0xc0] sm:$0xf]  ;;  %v3654_v12 = vld [vmem:[#allocation5 + $0xc4] sm:$0xf0] }
 0x43b   : > { %v2026_v34 = vpack.c.bf16 %v1962_v55, %v1960_v26  ;;  %v2022_v36 = vpack.c.bf16 %v1954_v38, %v1952_v46  ;;  %2263 = vmatpush.bf16.msra.mxu3 %v3284_v1  ;;  %v1868_v26 = vmul.f32 %v4992_v43, %v5264_v39  ;;  %v1948_v55 = vmax.f32 %v1916_v45, 0.0  ;;  %v3323_v46 = vld [vmem:[#allocation5 + $0xb0] sm:$0xf]  ;;  %v3315_v28 = vld [vmem:[#allocation5 + $0xa0] sm:$0xf] }
 0x43c   : > { %2043 = vmatpush.bf16.msra.mxu0 %v2025_v2  ;;  %v1990_v39 = vand.u32 2147483647, %v5023_v29  ;;  %v1992_v43 = vand.u32 2147483648, %v5023_v29  ;;  %v1985_v48 = vadd.f32 %v5046_v23, %v1984_v14  ;;  %v3259_v29 = vld [vmem:[#allocation5 + $0x30] sm:$0xf]  ;;  %v1908_v30 = vadd.f32 %v5011_v20, %v1870_v8 }
 0x43d   : > { %2028 = vmatpush.bf16.msra.mxu2 %v2026_v34  ;;  %v2020_v2 = vpack.c.bf16 %v1950_v9, %v1948_v55  ;;  %v1906_v59 = vadd.f32 %v5011_v20, %v1868_v26  ;;  %v1942_v51 = vmax.f32 %v1910_v58, 0.0  ;;  %v2008_v52 = vor.u32 1.1754944e-38, %v2007_v49  ;;  %v3652_v9 = vld [vmem:[#allocation5 + $0xb4] sm:$0xf0]  ;;  %v3643_v14 = vld [vmem:[#allocation5 + $0x74] sm:$0xf] }
 0x43e   : > { %vm1991_vm10 = vcmp.eq.f32.partialorder %v1990_v39, 8.507059e+37  ;;  %v1993_v41 = vor.u32 1.1754944e-38, %v1992_v43  ;;  %v2004_v10 = vsel %vm5092_vm9, %v5050_v56, %v2000_v40  ;;  %vm2006_vm11 = vcmp.eq.f32.partialorder %v2005_v57, 8.507059e+37  ;;  %v3285_v26 = vld [vmem:[#allocation5 + $0x68] sm:$0xf0] }
 0x43f   : > { %2264 = vmatpush.bf16.msra.mxu3 %v3276_v44  ;;  %v3260_v6 = vor.u32 %v3636_v19, %v3259_v29  ;;  %v1904_v54 = vadd.f32 %v5011_v20, %v1866_v35  ;;  %v1940_v63 = vmax.f32 %v1908_v30, 0.0  ;;  %v2009_v11 = vsel %vm2006_vm11, %v2008_v52, %v2004_v10  ;;  %v3641_v44 = vld [vmem:[#allocation5 + $0x64] sm:$0xf]  ;;  %v3650_v60 = vld [vmem:[#allocation5 + $0xa4] sm:$0xf0] }
 0x440   : > { %2044 = vmatpush.bf16.msra.mxu0 %v2023_v17  ;;  %v1938_v3 = vmax.f32 %v1906_v59, 0.0  ;;  %v1900_v56 = vadd.f32 %v5011_v20, %v1862_v4  ;;  %v2010_v24 = vmul.f32 %v4967_v25, %v2009_v11  ;;  %v3288_v55 = vor.u32 %v3641_v44, %v3285_v26  ;;  %v3639_v8 = vld [vmem:[#allocation5 + $0x54] sm:$0xf]  ;;  %v3277_v39 = vld [vmem:[#allocation5 + $0x58] sm:$0xf0] }
 0x441   : > { %2029 = vmatpush.bf16.msra.mxu2 %v2024_v22  ;;  %v2016_v37 = vpack.c.bf16 %v1942_v51, %v1940_v63  ;;  %v3660_v22 = vld [vmem:[#allocation5 + $0xf4] sm:$0xf0]  ;;  %v3316_v58 = vor.u32 %v3650_v60, %v3315_v28  ;;  %v3280_v43 = vor.u32 %v3639_v8, %v3277_v39  ;;  %v3307_v49 = vld [vmem:[#allocation5 + $0x90] sm:$0xf]  ;;  %v3269_v40 = vld [vmem:[#allocation5 + $0x48] sm:$0xf0] }
 0x442   : > { %v1932_v32 = vmax.f32 %v1900_v56, 0.0  ;;  %v3251_v57 = vld [vmem:[#allocation5 + $0x20] sm:$0xf]  ;;  %v3646_v59 = vld [vmem:[#allocation5 + $0x84] sm:$0xf0] }
 0x443   : > { %2265 = vmatpush.bf16.msra.mxu3 %v3268_v15  ;;  %v3634_v15 = vld [vmem:[#allocation5 + $0x24] sm:$0xf0]  ;;  %v3299_v35 = vld [vmem:[#allocation5 + $0x80] sm:$0xf]  ;;  %v3635_v30 = vld [vmem:[#allocation5 + $0x34] sm:$0xf] }
 0x444   : > { %2045 = vmatpush.bf16.msra.mxu0 %v2021_v50  ;;  %v3324_v50 = vor.u32 %v3652_v9, %v3323_v46  ;;  %v3252_v19 = vor.u32 %v3634_v15, %v3251_v57  ;;  %v3261_v52 = vld [vmem:[#allocation5 + $0x38] sm:$0xf0]  ;;  %v3633_v10 = vld [vmem:[#allocation5 + $0x24] sm:$0xf]  ;;  %v3630_v63 = vld [vmem:[#allocation5 + $0x4] sm:$0xf0] }
 0x445   : > { %2030 = vmatpush.bf16.msra.mxu2 %v2022_v36  ;;  %v3296_v36 = vor.u32 %v3643_v14, %v3293_v61  ;;  %v3631_v11 = vld [vmem:[#allocation5 + $0x14] sm:$0xf]  ;;  %v3657_v56 = vld [vmem:[#allocation5 + $0xe4] sm:$0xf]  ;;  %v3309_v61 = vld [vmem:[#allocation5 + $0x98] sm:$0xf0] }
 0x446   : > { %v3647_v14 = vld [vmem:[#allocation5 + $0x94] sm:$0xf]  ;;  %v3645_v44 = vld [vmem:[#allocation5 + $0x84] sm:$0xf]  ;;  %v3301_v26 = vld [vmem:[#allocation5 + $0x88] sm:$0xf0] }
 0x447   : > { %2266 = vmatpush.bf16.msra.mxu3 %v3260_v6  ;;  %v3253_v6 = vld [vmem:[#allocation5 + $0x28] sm:$0xf0]  ;;  %v3304_v28 = vor.u32 %v3645_v44, %v3301_v26  ;;  %v2057_v8 = vld [vmem:[%s747_s22 + $0x8] sm:$0xff]  ;;  %v3674_v15 = vld [vmem:[#allocation7 + $0x64] sm:$0xf0] }
 0x448   : > { %2046 = vmatpush.bf16.msra.mxu0 %v5015_v33  ;;  %v1989_v33 = vsel %vm5086_vm8, %v5046_v23, %v1985_v48  ;;  %v1902_v23 = vadd.f32 %v5011_v20, %v1864_v47  ;;  %v3658_v20 = vld [vmem:[#allocation5 + $0xe4] sm:$0xf0]  ;;  %v3637_v48 = vld [vmem:[#allocation5 + $0x44] sm:$0xf]  ;;  %v3632_v47 = vld [vmem:[#allocation5 + $0x14] sm:$0xf0]  ;;  %v3256_v4 = vor.u32 %v3633_v10, %v3253_v6 }
 0x449   : > { %2031 = vmatpush.bf16.msra.mxu2 %v2020_v2  ;;  %v1994_v27 = vsel %vm1991_vm10, %v1993_v41, %v1989_v33  ;;  %v3648_v2 = vld [vmem:[#allocation5 + $0x94] sm:$0xf0]  ;;  %v3272_v29 = vor.u32 %v3637_v48, %v3269_v40  ;;  %v3244_v51 = vor.u32 %v3632_v47, %v3243_v16  ;;  %v3300_v41 = vor.u32 %v3646_v59, %v3299_v35  ;;  %v3419_v48 = vld [vmem:[#allocation7 + $0x70] sm:$0xf]  ;;  %v3411_v40 = vld [vmem:[#allocation7 + $0x60] sm:$0xf] }
 0x44a   : > { %v1995_v0 = vmul.f32 %v4965_v21, %v1994_v27  ;;  %v1934_v38 = vmax.f32 %v1902_v23, 0.0  ;;  %v3339_v21 = vld [vmem:[#allocation5 + $0xd0] sm:$0xf]  ;;  %v3308_v34 = vor.u32 %v3648_v2, %v3307_v49  ;;  %v3264_v33 = vor.u32 %v3635_v30, %v3261_v52  ;;  %v3245_v23 = vld [vmem:[#allocation5 + $0x18] sm:$0xf0]  ;;  %v2058_v49 = vld [vmem:[%s747_s22 + $0x10] sm:$0xff] }
 0x44b   : > { %v3340_v25 = vor.u32 %v3656_v7, %v3339_v21  ;;  %2267 = vmatpush.bf16.msra.mxu3 %v3252_v19  ;;  %v3651_v21 = vld [vmem:[#allocation5 + $0xb4] sm:$0xf]  ;;  %v3325_v7 = vld [vmem:[#allocation5 + $0xb8] sm:$0xf0]  ;;  %v3412_v16 = vor.u32 %v3674_v15, %v3411_v40  ;;  %v3672_v19 = vld [vmem:[#allocation7 + $0x54] sm:$0xf0] }
 0x44c   : > { %2047 = vmatpush.bf16.msra.mxu0 %v5004_v62  ;;  %v1936_v62 = vmax.f32 %v1904_v54, 0.0  ;;  %v2011_v18 = vpack.c.bf16 %v2010_v24, %v1995_v0  ;;  %v2012_v13 = vpack.c.bf16 %v1934_v38, %v1932_v32  ;;  %v3235_v54 = vld [vmem:[#allocation5] sm:$0xf]  ;;  %v3349_v24 = vld [vmem:[#allocation5 + $0xe8] sm:$0xf0] }
 0x44d   : > { %2032 = vmatpush.bf16.msra.mxu2 %v5018_v42  ;;  %v3355_v42 = vld [vmem:[#allocation5 + $0xf0] sm:$0xf]  ;;  %v3236_v27 = vor.u32 %v3630_v63, %v3235_v54  ;;  %v3352_v38 = vor.u32 %v3657_v56, %v3349_v24  ;;  %v3341_v32 = vld [vmem:[#allocation5 + $0xd8] sm:$0xf0]  ;;  %v3395_v35 = vld [vmem:[#allocation7 + $0x40] sm:$0xf] }
 0x44e   : > { %v2014_v17 = vpack.c.bf16 %v1938_v3, %v1936_v62  ;;  %v3356_v1 = vor.u32 %v3660_v22, %v3355_v42  ;;  %v3659_v3 = vld [vmem:[#allocation5 + $0xf4] sm:$0xf]  ;;  %v3248_v62 = vor.u32 %v3631_v11, %v3245_v23  ;;  %v3237_v42 = vld [vmem:[#allocation5 + $0x8] sm:$0xf0]  ;;  %v3670_v59 = vld [vmem:[#allocation7 + $0x44] sm:$0xf0] }
 0x44f   : > { %2268 = vmatpush.bf16.msra.mxu3 %v3244_v51  ;;  %v3655_v22 = vld [vmem:[#allocation5 + $0xd4] sm:$0xf]  ;;  %v3396_v30 = vor.u32 %v3670_v59, %v3395_v35  ;;  %v3413_v10 = vld [vmem:[#allocation7 + $0x68] sm:$0xf0]  ;;  %v3405_v54 = vld [vmem:[#allocation7 + $0x58] sm:$0xf0] }
 0x450   : > { %2048 = vmatpush.bf16.msra.mxu0 %v4994_v53  ;;  %v3347_v53 = vld [vmem:[#allocation5 + $0xe0] sm:$0xf]  ;;  %v3675_v51 = vld [vmem:[#allocation7 + $0x74] sm:$0xf]  ;;  %v3397_v11 = vld [vmem:[#allocation7 + $0x48] sm:$0xf0] }
 0x451   : > { %2033 = vmatpush.bf16.msra.mxu2 %v2016_v37  ;;  %v3348_v45 = vor.u32 %v3658_v20, %v3347_v53  ;;  %v3357_v37 = vld [vmem:[#allocation5 + $0xf8] sm:$0xf0]  ;;  %v3333_v53 = vld [vmem:[#allocation5 + $0xc8] sm:$0xf0]  ;;  %v3387_v23 = vld [vmem:[#allocation7 + $0x30] sm:$0xf] }
 0x452   : > { %v3360_v0 = vor.u32 %v3659_v3, %v3357_v37  ;;  %v3668_v3 = vld [vmem:[#allocation7 + $0x34] sm:$0xf0]  ;;  %v3379_v37 = vld [vmem:[#allocation7 + $0x20] sm:$0xf]  ;;  %v3483_v44 = vld [vmem:[#allocation7 + $0xf0] sm:$0xf] }
 0x453   : > { %2269 = vmatpush.bf16.msra.mxu3 %v3236_v27  ;;  %v3669_v27 = vld [vmem:[#allocation7 + $0x44] sm:$0xf]  ;;  %v3692_v26 = vld [vmem:[#allocation7 + $0xf4] sm:$0xf0]  ;;  %v3459_v35 = vld [vmem:[#allocation7 + $0xc0] sm:$0xf] }
 0x454   : > { %2049 = vmatpush.bf16.msra.mxu0 %v4984_v5  ;;  %v3332_v5 = vor.u32 %v3654_v12, %v3331_v31  ;;  %v3317_v31 = vld [vmem:[#allocation5 + $0xa8] sm:$0xf0]  ;;  %v3400_v56 = vor.u32 %v3669_v27, %v3397_v11  ;;  %v3686_v59 = vld [vmem:[#allocation7 + $0xc4] sm:$0xf0] }
 0x455   : > { %2034 = vmatpush.bf16.msra.mxu2 %v2014_v17  ;;  %v3629_v17 = vld [vmem:[#allocation5 + $0x4] sm:$0xf] }
 0x457   : > { %2050 = vmatmul.bf16.vlgmr.msra.gmra.mxu0 %v2011_v18  ;;  %2319 = vmatpush.bf16.msrb.mxu3 %v3360_v0  ;;  %v3666_v0 = vld [vmem:[#allocation7 + $0x24] sm:$0xf0] }
 0x458   : > { %2300 = vmatpush.bf16.msrb.mxu0 %v3296_v36  ;;  %v3312_v36 = vor.u32 %v3647_v14, %v3309_v61  ;;  %v3380_v24 = vor.u32 %v3666_v0, %v3379_v37 }
 0x459   : > { %2035 = vmatpush.bf16.msra.mxu2 %v2012_v13  ;;  %v3653_v13 = vld [vmem:[#allocation5 + $0xc4] sm:$0xf] }
 0x45b   : > { %2320 = vmatpush.bf16.msrb.mxu3 %v3352_v38  ;;  %v3667_v38 = vld [vmem:[#allocation7 + $0x34] sm:$0xf] }
 0x45c   : > { %2036 = vmatmul.bf16.vlgmr.msra.gmra.mxu2 %v2011_v18  ;;  %2301 = vmatpush.bf16.msrb.mxu0 %v3288_v55  ;;  %v3240_v18 = vor.u32 %v3629_v17, %v3237_v42  ;;  %v3389_v17 = vld [vmem:[#allocation7 + $0x38] sm:$0xf0] }
 0x45d   : > { %2281 = vmatpush.bf16.msrb.mxu2 %v3356_v1  ;;  %v3344_v1 = vor.u32 %v3655_v22, %v3341_v32  ;;  %v3392_v42 = vor.u32 %v3667_v38, %v3389_v17  ;;  %v3665_v22 = vld [vmem:[#allocation7 + $0x24] sm:$0xf]  ;;  %v3381_v32 = vld [vmem:[#allocation7 + $0x28] sm:$0xf0] }
 0x45f   : > { %2321 = vmatpush.bf16.msrb.mxu3 %v3344_v1  ;;  %v3371_v1 = vld [vmem:[#allocation7 + $0x10] sm:$0xf] }
 0x460   : > { %2302 = vmatpush.bf16.msrb.mxu0 %v3280_v43  ;;  %v2056_v43 = vld [vmem:[%s747_s22] sm:$0xff] }
 0x461   : > { %2282 = vmatpush.bf16.msrb.mxu2 %v3348_v45  ;;  %v3336_v45 = vor.u32 %v3653_v13, %v3333_v53  ;;  %v2062_v2 = vpack.c.bf16 %v2058_v49, %v2056_v43  ;;  %v3664_v13 = vld [vmem:[#allocation7 + $0x14] sm:$0xf0]  ;;  %v3363_v53 = vld [vmem:[#allocation7] sm:$0xf]  ;;  %v3467_v43 = vld [vmem:[#allocation7 + $0xd0] sm:$0xf] }
 0x462   : > { %v3688_v49 = vld [vmem:[#allocation7 + $0xd4] sm:$0xf0] }
 0x463   : > { %2322 = vmatpush.bf16.msrb.mxu3 %v3336_v45  ;;  %v3662_v45 = vld [vmem:[#allocation7 + $0x4] sm:$0xf0]  ;;  %v3468_v40 = vor.u32 %v3688_v49, %v3467_v43 }
 0x464   : > { %2303 = vmatpush.bf16.msrb.mxu0 %v3272_v29  ;;  %v3403_v29 = vld [vmem:[#allocation7 + $0x50] sm:$0xf] }
 0x465   : > { %2283 = vmatpush.bf16.msrb.mxu2 %v3340_v25  ;;  %v3649_v25 = vld [vmem:[#allocation5 + $0xa4] sm:$0xf]  ;;  %v3404_v47 = vor.u32 %v3672_v19, %v3403_v29  ;;  %v3461_v29 = vld [vmem:[#allocation7 + $0xc8] sm:$0xf0] }
 0x466   : > { %v3320_v9 = vor.u32 %v3649_v25, %v3317_v31  ;;  %v3364_v31 = vor.u32 %v3662_v45, %v3363_v53  ;;  %v3429_v53 = vld [vmem:[#allocation7 + $0x88] sm:$0xf0] }
 0x468   : > { %2304 = vmatpush.bf16.msrb.mxu0 %v3264_v33  ;;  %v3673_v33 = vld [vmem:[#allocation7 + $0x64] sm:$0xf] }
 0x469   : > { %2284 = vmatpush.bf16.msrb.mxu2 %v3332_v5  ;;  %v3328_v5 = vor.u32 %v3651_v21, %v3325_v7  ;;  %v3416_v6 = vor.u32 %v3673_v33, %v3413_v10  ;;  %v3663_v21 = vld [vmem:[#allocation7 + $0x14] sm:$0xf]  ;;  %v3373_v7 = vld [vmem:[#allocation7 + $0x18] sm:$0xf0]  ;;  %v3451_v10 = vld [vmem:[#allocation7 + $0xb0] sm:$0xf] }
 0x46a   : > { %v3376_v25 = vor.u32 %v3663_v21, %v3373_v7 }
 0x46b   : > { %2323 = vmatpush.bf16.msrb.mxu3 %v3328_v5  ;;  %v3365_v5 = vld [vmem:[#allocation7 + $0x8] sm:$0xf0] }
 0x46c   : > { %2305 = vmatpush.bf16.msrb.mxu0 %v3256_v4  ;;  %v3671_v4 = vld [vmem:[#allocation7 + $0x54] sm:$0xf] }
 0x46d   : > { %2285 = vmatpush.bf16.msrb.mxu2 %v3324_v50  ;;  %v3408_v63 = vor.u32 %v3671_v4, %v3405_v54  ;;  %v3681_v4 = vld [vmem:[#allocation7 + $0xa4] sm:$0xf]  ;;  %v3445_v54 = vld [vmem:[#allocation7 + $0xa8] sm:$0xf0] }
 0x46e   : > { %v3448_v37 = vor.u32 %v3681_v4, %v3445_v54  ;;  %v3697_v4 = vld [vmem:[#allocation8 + $0x20] sm:$0xff]  ;;  %v3696_v54 = vld [vmem:[#allocation8 + $0x18] sm:$0xff] }
 0x46f   : > { %2324 = vmatpush.bf16.msrb.mxu3 %v3320_v9  ;;  %v3485_v9 = vld [vmem:[#allocation7 + $0xf8] sm:$0xf0] }
 0x470   : > { %2306 = vmatpush.bf16.msrb.mxu0 %v3248_v62  ;;  %v3388_v62 = vor.u32 %v3668_v3, %v3387_v23 }
 0x471   : > { %2286 = vmatpush.bf16.msrb.mxu2 %v3316_v58  ;;  %v2059_v58 = vld [vmem:[%s747_s22 + $0x18] sm:$0xff]  ;;  %s5285_s22 = sld [smem:[#allocation39_spill]] }
 0x472   : > { %v2063_v39 = vpack.c.bf16 %v2059_v58, %v2057_v8  ;;  %v3690_v8 = vld [vmem:[#allocation7 + $0xe4] sm:$0xf0] }
 0x473   : > { %2325 = vmatpush.bf16.msrb.mxu3 %v3312_v36  ;;  %v3477_v36 = vld [vmem:[#allocation7 + $0xe8] sm:$0xf0] }
 0x474   : > { %2307 = vmatpush.bf16.msrb.mxu0 %v3240_v18  ;;  %v3384_v18 = vor.u32 %v3665_v22, %v3381_v32  ;;  %v3437_v22 = vld [vmem:[#allocation7 + $0x98] sm:$0xf0] }
 0x475   : > { %2287 = vmatpush.bf16.msrb.mxu2 %v3308_v34  ;;  %v3676_v34 = vld [vmem:[#allocation7 + $0x74] sm:$0xf0] }
 0x476   : > { %v3420_v57 = vor.u32 %v3676_v34, %v3419_v48  ;;  %v3469_v48 = vld [vmem:[#allocation7 + $0xd8] sm:$0xf0]  ;;  %v3685_v34 = vld [vmem:[#allocation7 + $0xc4] sm:$0xf] }
 0x477   : > { %2326 = vmatpush.bf16.msrb.mxu3 %v3304_v28  ;;  %s753_s23 = scalar_lea.vmem %s5285_s22, %s3054_s18 }
 0x479   : > { %2288 = vmatpush.bf16.msrb.mxu2 %v3300_v41  ;;  %v3421_v41 = vld [vmem:[#allocation7 + $0x78] sm:$0xf0] }
 0x47a   : > { %v3424_v52 = vor.u32 %v3675_v51, %v3421_v41  ;;  %v3453_v51 = vld [vmem:[#allocation7 + $0xb8] sm:$0xf0]  ;;  %v3460_v41 = vor.u32 %v3686_v59, %v3459_v35 }
 0x47d   : > { %2548 = vmatpush.bf16.msra.mxu2 %v3420_v57  ;;  %v5130_v57 = vld [vmem:[%s5196_s9] sm:$0x3] }
 0x47e   : > { %v2098_v19 = vperm.slane %v5130_v57, 0 }
 0x481   : > { %2549 = vmatpush.bf16.msra.mxu2 %v3412_v16 }
 0x485   : > { %2550 = vmatpush.bf16.msra.mxu2 %v3404_v47  ;;  %v3464_v47 = vor.u32 %v3685_v34, %v3461_v29 }
 0x489   : > { %2551 = vmatpush.bf16.msra.mxu2 %v3396_v30  ;;  %v3683_v30 = vld [vmem:[#allocation7 + $0xb4] sm:$0xf] }
 0x48a   : > { %v3456_v33 = vor.u32 %v3683_v30, %v3453_v51 }
 0x48d   : > { %2552 = vmatpush.bf16.msra.mxu2 %v3388_v62  ;;  %v3682_v62 = vld [vmem:[#allocation7 + $0xa4] sm:$0xf0] }
 0x491   : > { %2553 = vmatpush.bf16.msra.mxu2 %v3380_v24 }
 0x4d4   : > { %v2051_v20 = vpop.f32.mrf.mxu0 }
 0x4dc   : > { %v2053_v12 = vpop.f32.mrf.mxu0 }
 0x4dd   : > { %v2061_v46 = vpack.c.bf16 %v2053_v12, %v2051_v20  ;;  %v3372_v20 = vor.u32 %v3664_v13, %v3371_v1  ;;  %v3661_v12 = vld [vmem:[#allocation7 + $0x4] sm:$0xf] }
 0x4de   : > { %v3368_v14 = vor.u32 %v3661_v12, %v3365_v5  ;;  %v3677_v13 = vld [vmem:[#allocation7 + $0x84] sm:$0xf]  ;;  %v3678_v12 = vld [vmem:[#allocation7 + $0x84] sm:$0xf0] }
 0x4df   : > { %v2037_v50 = vpop.f32.mrf.mxu2  ;;  %2289 = vmatmul.bf16.vlgmr.msrb.gmra.mxu2 %v2061_v46 }
 0x4e0   : > { %2554 = vmatpush.bf16.msra.mxu2 %v3372_v20  ;;  %v3680_v20 = vld [vmem:[#allocation7 + $0x94] sm:$0xf0] }
 0x4e4   : > { %2555 = vmatpush.bf16.msra.mxu2 %v3364_v31  ;;  %v3427_v31 = vld [vmem:[#allocation7 + $0x80] sm:$0xf] }
 0x4e5   : > { %v3428_v5 = vor.u32 %v3678_v12, %v3427_v31 }
 0x4e7   : > { %v2039_v55 = vpop.f32.mrf.mxu2 }
 0x4e8   : > { %v2060_v60 = vpack.c.bf16 %v2039_v55, %v2037_v50  ;;  %v3689_v50 = vld [vmem:[#allocation7 + $0xe4] sm:$0xf]  ;;  %v3484_v55 = vor.u32 %v3692_v26, %v3483_v44 }
 0x4e9   : > { %v3480_v28 = vor.u32 %v3689_v50, %v3477_v36 }
 0x4ea   : > { %2270 = vmatmul.bf16.vlgmr.msra.gmra.mxu3 %v2060_v60  ;;  %2308 = vmatmul.bf16.vlgmr.msrb.gmra.mxu0 %v2060_v60  ;;  %v3475_v60 = vld [vmem:[#allocation7 + $0xe0] sm:$0xf] }
 0x4eb   : > { %2582 = vmatpush.bf16.msra.mxu3 %v3424_v52  ;;  %2565 = vmatpush.bf16.msra.mxu0 %v3484_v55  ;;  %v3476_v58 = vor.u32 %v3690_v8, %v3475_v60  ;;  %v2099_v8 = vperm.slane %v5130_v57, 1 }
 0x4ef   : > { %2294 = vmatmul.bf16.gmra.mxu2 %v2063_v39  ;;  %2583 = vmatpush.bf16.msra.mxu3 %v3416_v6  ;;  %v3684_v6 = vld [vmem:[#allocation7 + $0xb4] sm:$0xf0] }
 0x4f0   : > { %2566 = vmatpush.bf16.msra.mxu0 %v3476_v58 }
 0x4f3   : > { %2584 = vmatpush.bf16.msra.mxu3 %v3408_v63  ;;  %v3452_v63 = vor.u32 %v3684_v6, %v3451_v10  ;;  %v3699_v10 = vld [vmem:[#allocation8 + $0x30] sm:$0xff]  ;;  %v3698_v6 = vld [vmem:[#allocation8 + $0x28] sm:$0xff] }
 0x4f4   : > { %2567 = vmatpush.bf16.msra.mxu0 %v3468_v40 }
 0x4f7   : > { %2585 = vmatpush.bf16.msra.mxu3 %v3400_v56  ;;  %v3443_v56 = vld [vmem:[#allocation7 + $0xa0] sm:$0xf] }
 0x4f8   : > { %2568 = vmatpush.bf16.msra.mxu0 %v3460_v41  ;;  %v3444_v24 = vor.u32 %v3682_v62, %v3443_v56 }
 0x4fa   : > { %2275 = vmatmul.bf16.gmra.mxu3 %v2062_v2  ;;  %2313 = vmatmul.bf16.gmra.mxu0 %v2062_v2  ;;  %v3687_v2 = vld [vmem:[#allocation7 + $0xd4] sm:$0xf] }
 0x4fb   : > { %2586 = vmatpush.bf16.msra.mxu3 %v3392_v42  ;;  %v3472_v16 = vor.u32 %v3687_v2, %v3469_v48  ;;  %v3679_v42 = vld [vmem:[#allocation7 + $0x94] sm:$0xf] }
 0x4fc   : > { %2569 = vmatpush.bf16.msra.mxu0 %v3452_v63  ;;  %v3440_v32 = vor.u32 %v3679_v42, %v3437_v22  ;;  %v3704_v42 = vld [vmem:[#allocation10 + $0x18] sm:$0xff]  ;;  %v3703_v22 = vld [vmem:[#allocation10 + $0x10] sm:$0xff] }
 0x4ff   : > { %2587 = vmatpush.bf16.msra.mxu3 %v3384_v18  ;;  %v3435_v18 = vld [vmem:[#allocation7 + $0x90] sm:$0xf] }
 0x500   : > { %2570 = vmatpush.bf16.msra.mxu0 %v3444_v24  ;;  %v3436_v7 = vor.u32 %v3680_v20, %v3435_v18  ;;  %v3705_v24 = vld [vmem:[#allocation10 + $0x20] sm:$0xff]  ;;  %v3702_v20 = vld [vmem:[#allocation10 + $0x8] sm:$0xff] }
 0x503   : > { %2588 = vmatpush.bf16.msra.mxu3 %v3376_v25  ;;  %v3432_v25 = vor.u32 %v3677_v13, %v3429_v53 }
 0x504   : > { %2571 = vmatpush.bf16.msra.mxu0 %v3436_v7  ;;  %v3701_v7 = vld [vmem:[#allocation10] sm:$0xff] }
 0x507   : > { %2589 = vmatpush.bf16.msra.mxu3 %v3368_v14 }
 0x508   : > { %2572 = vmatpush.bf16.msra.mxu0 %v3428_v5 }
 0x50a   : > { %2327 = vmatmul.bf16.vlgmr.msrb.gmra.mxu3 %v2061_v46  ;;  %v3691_v46 = vld [vmem:[#allocation7 + $0xf4] sm:$0xf] }
 0x50b   : > { %v3488_v61 = vor.u32 %v3691_v46, %v3485_v9 }
 0x50d   : > { %2599 = vmatpush.bf16.msrb.mxu2 %v3488_v61 }
 0x511   : > { %2600 = vmatpush.bf16.msrb.mxu2 %v3480_v28 }
 0x515   : > { %2601 = vmatpush.bf16.msrb.mxu2 %v3472_v16 }
 0x519   : > { %2602 = vmatpush.bf16.msrb.mxu2 %v3464_v47 }
 0x51a   : > { %2332 = vmatmul.bf16.gmra.mxu3 %v2063_v39 }
 0x51d   : > { %2603 = vmatpush.bf16.msrb.mxu2 %v3456_v33  ;;  %v3700_v33 = vld [vmem:[#allocation8 + $0x38] sm:$0xff] }
 0x51e   : > { %2764 = vmatpush.bf16.msrb.mxu3 %v3700_v33 }
 0x521   : > { %2604 = vmatpush.bf16.msrb.mxu2 %v3448_v37  ;;  %v3694_v37 = vld [vmem:[#allocation8 + $0x8] sm:$0xff] }
 0x522   : > { %2765 = vmatpush.bf16.msrb.mxu3 %v3699_v10 }
 0x525   : > { %2605 = vmatpush.bf16.msrb.mxu2 %v3440_v32  ;;  %v2382_v32 = vld [vmem:[%s5198_s11] sm:$0x3] }
 0x526   : > { %2766 = vmatpush.bf16.msrb.mxu3 %v3698_v6  ;;  %v2384_v13 = vperm.slane %v2382_v32, 0 }
 0x529   : > { %2606 = vmatpush.bf16.msrb.mxu2 %v3432_v25  ;;  %v3716_v25 = vld [vmem:[%s5202_s15 + $0x38] sm:$0xff] }
 0x52a   : > { %2767 = vmatpush.bf16.msrb.mxu3 %v3697_v4  ;;  %2855 = vmatpush.bf16.msrb.mxu1 %v3716_v25 }
 0x52e   : > { %2768 = vmatpush.bf16.msrb.mxu3 %v3696_v54 }
 0x562   : > { %v2290_v39 = vpop.f32.mrf.mxu2 }
 0x567   : > { %v2309_v50 = vpop.f32.mrf.mxu0 }
 0x56a   : > { %v2292_v11 = vpop.f32.mrf.mxu2 }
 0x56d   : > { %v2271_v15 = vpop.f32.mrf.mxu3 }
 0x56e   : > { %v2272_v52 = vadd.f32 %v2271_v15, %v2098_v19 }
 0x56f   : > { %v2311_v58 = vpop.f32.mrf.mxu0 }
 0x570   : > { %v2291_v23 = vadd.f32 %v2290_v39, %v2272_v52  ;;  %v2310_v39 = vadd.f32 %v2309_v50, %v2099_v8  ;;  %v2312_v49 = vadd.f32 %v2311_v58, %v2099_v8 }
 0x572   : > { %v2338_v38 = vmax.f32 %v2291_v23, 0.0  ;;  %v2295_v21 = vpop.f32.mrf.mxu2  ;;  %v3707_v23 = vld [vmem:[#allocation10 + $0x30] sm:$0xff] }
 0x575   : > { %v2273_v27 = vpop.f32.mrf.mxu3 }
 0x576   : > { %v2274_v3 = vadd.f32 %v2273_v27, %v2098_v19 }
 0x577   : > { %v2314_v34 = vpop.f32.mrf.mxu0 }
 0x578   : > { %v2293_v0 = vadd.f32 %v2292_v11, %v2274_v3  ;;  %v3708_v11 = vld [vmem:[#allocation10 + $0x38] sm:$0xff]  ;;  %v3695_v3 = vld [vmem:[#allocation8 + $0x10] sm:$0xff] }
 0x579   : > { %2702 = vmatpush.bf16.msrb.mxu0 %v3708_v11  ;;  %2769 = vmatpush.bf16.msrb.mxu3 %v3695_v3 }
 0x57a   : > { %v2340_v17 = vmax.f32 %v2293_v0, 0.0  ;;  %v2297_v36 = vpop.f32.mrf.mxu2  ;;  %v3706_v0 = vld [vmem:[#allocation10 + $0x28] sm:$0xff] }
 0x57c   : > { %v2346_v1 = vpack.c.bf16 %v2340_v17, %v2338_v38  ;;  %v3693_v38 = vld [vmem:[#allocation8] sm:$0xff] }
 0x57d   : > { %v2276_v45 = vpop.f32.mrf.mxu3  ;;  %2703 = vmatpush.bf16.msrb.mxu0 %v3707_v23  ;;  %2770 = vmatpush.bf16.msrb.mxu3 %v3694_v37  ;;  %v3805_v23 = vld [vmem:[%s5284_s12] ss:$0 sm:$0xff] }
 0x57e   : > { %2556 = vmatmul.bf16.vlgmr.msra.gmra.mxu2 %v2346_v1  ;;  %2590 = vmatmul.bf16.vlgmr.msra.gmra.mxu3 %v2346_v1  ;;  %v2277_v46 = vadd.f32 %v2276_v45, %v2098_v19 }
 0x57f   : > { %v2316_v47 = vpop.f32.mrf.mxu0 }
 0x580   : > { %v2296_v14 = vadd.f32 %v2295_v21, %v2277_v46  ;;  %v2317_v59 = vadd.f32 %v2316_v47, %v2099_v8  ;;  %v3715_v46 = vld [vmem:[%s5202_s15 + $0x30] sm:$0xff]  ;;  %v3709_v47 = vld [vmem:[%s5202_s15] sm:$0xff] }
 0x581   : > { %2704 = vmatpush.bf16.msrb.mxu0 %v3706_v0  ;;  %2771 = vmatpush.bf16.msrb.mxu3 %v3693_v38 }
 0x582   : > { %v2342_v26 = vmax.f32 %v2296_v14, 0.0  ;;  %2856 = vmatpush.bf16.msrb.mxu1 %v3715_v46 }
 0x585   : > { %v2278_v9 = vpop.f32.mrf.mxu3  ;;  %2705 = vmatpush.bf16.msrb.mxu0 %v3705_v24 }
 0x586   : > { %v2279_v61 = vadd.f32 %v2278_v9, %v2098_v19  ;;  %v2315_v19 = vadd.f32 %v2314_v34, %v2099_v8 }
 0x588   : > { %v2298_v44 = vadd.f32 %v2297_v36, %v2279_v61  ;;  %v3714_v61 = vld [vmem:[%s5202_s15 + $0x28] sm:$0xff] }
 0x589   : > { %2706 = vmatpush.bf16.msrb.mxu0 %v3704_v42  ;;  %2857 = vmatpush.bf16.msrb.mxu1 %v3714_v61  ;;  %v3806_v42 = vld [vmem:[#allocation2] ss:$0 sm:$0xff] }
 0x58a   : > { %v2344_v55 = vmax.f32 %v2298_v44, 0.0 }
 0x58c   : > { %v2348_v28 = vpack.c.bf16 %v2344_v55, %v2342_v26 }
 0x58d   : > { %v2328_v60 = vpop.f32.mrf.mxu3  ;;  %2707 = vmatpush.bf16.msrb.mxu0 %v3703_v22 }
 0x58e   : > { %2561 = vmatmul.bf16.gmra.mxu2 %v2348_v28  ;;  %2593 = vmatmul.bf16.gmra.mxu3 %v2348_v28  ;;  %v2329_v43 = vadd.f32 %v2328_v60, %v2310_v39  ;;  %v2385_v60 = vperm.slane %v2382_v32, 1 }
 0x590   : > { %v2339_v40 = vmax.f32 %v2329_v43, 0.0 }
 0x591   : > { %2708 = vmatpush.bf16.msrb.mxu0 %v3702_v20 }
 0x595   : > { %v2330_v2 = vpop.f32.mrf.mxu3  ;;  %2709 = vmatpush.bf16.msrb.mxu0 %v3701_v7 }
 0x596   : > { %v2331_v48 = vadd.f32 %v2330_v2, %v2312_v49 }
 0x598   : > { %v2341_v15 = vmax.f32 %v2331_v48, 0.0 }
 0x59a   : > { %v2347_v16 = vpack.c.bf16 %v2341_v15, %v2339_v40  ;;  %v3713_v15 = vld [vmem:[%s5202_s15 + $0x20] sm:$0xff] }
 0x59b   : > { %2858 = vmatpush.bf16.msrb.mxu1 %v3713_v15 }
 0x59c   : > { %2573 = vmatmul.bf16.vlgmr.msra.gmra.mxu0 %v2347_v16 }
 0x59d   : > { %v2333_v29 = vpop.f32.mrf.mxu3 }
 0x59e   : > { %2607 = vmatmul.bf16.vlgmr.msrb.gmra.mxu2 %v2347_v16  ;;  %v2334_v35 = vadd.f32 %v2333_v29, %v2315_v19  ;;  %v3712_v16 = vld [vmem:[%s5202_s15 + $0x18] sm:$0xff]  ;;  %v3711_v29 = vld [vmem:[%s5202_s15 + $0x10] sm:$0xff]  ;;  %v3710_v19 = vld [vmem:[%s5202_s15 + $0x8] sm:$0xff] }
 0x59f   : > { %2859 = vmatpush.bf16.msrb.mxu1 %v3712_v16 }
 0x5a0   : > { %v2343_v51 = vmax.f32 %v2334_v35, 0.0 }
 0x5a3   : > { %2860 = vmatpush.bf16.msrb.mxu1 %v3711_v29 }
 0x5a5   : > { %v2335_v57 = vpop.f32.mrf.mxu3 }
 0x5a6   : > { %v2336_v30 = vadd.f32 %v2335_v57, %v2317_v59 }
 0x5a7   : > { %2861 = vmatpush.bf16.msrb.mxu1 %v3710_v19 }
 0x5a8   : > { %v2345_v41 = vmax.f32 %v2336_v30, 0.0  ;;  %v3803_v30 = vld [vmem:[%s5201_s14] ss:$0 sm:$0xff] }
 0x5aa   : > { %v2349_v52 = vpack.c.bf16 %v2345_v41, %v2343_v51 }
 0x5ab   : > { %2862 = vmatpush.bf16.msrb.mxu1 %v3709_v47 }
 0x5ac   : > { %2578 = vmatmul.bf16.gmra.mxu0 %v2349_v52 }
 0x5ae   : > { %2610 = vmatmul.bf16.gmra.mxu2 %v2349_v52 }
 0x601   : > { %v2557_v63 = vpop.f32.mrf.mxu2  ;;  %v2591_v27 = vpop.f32.mrf.mxu3 }
 0x602   : > { %v2558_v53 = vadd.f32 %v2557_v63, %v2384_v13  ;;  %v3804_v63 = vld [vmem:[%s5283_s27] ss:$0 sm:$0xff] }
 0x609   : > { %v2559_v56 = vpop.f32.mrf.mxu2  ;;  %v2592_v62 = vpop.f32.mrf.mxu3 }
 0x60a   : > { %v2560_v45 = vadd.f32 %v2559_v56, %v2384_v13 }
 0x611   : > { %v2562_v17 = vpop.f32.mrf.mxu2  ;;  %v2594_v26 = vpop.f32.mrf.mxu3 }
 0x612   : > { %v2595_v58 = vadd.f32 %v2594_v26, %v2385_v60 }
 0x619   : > { %v2563_v18 = vpop.f32.mrf.mxu2  ;;  %v2574_v1 = vpop.f32.mrf.mxu0 }
 0x61a   : > { %v2575_v21 = vadd.f32 %v2574_v1, %v2558_v53  ;;  %v2596_v8 = vpop.f32.mrf.mxu3 }
 0x61b   : > { %v2597_v43 = vadd.f32 %v2596_v8, %v2385_v60 }
 0x61c   : > { %v2616_v9 = vmax.f32 %v2575_v21, 0.0 }
 0x621   : > { %v2608_v31 = vpop.f32.mrf.mxu2  ;;  %v2576_v12 = vpop.f32.mrf.mxu0 }
 0x622   : > { %v2577_v5 = vadd.f32 %v2576_v12, %v2560_v45 }
 0x624   : > { %v2617_v50 = vmax.f32 %v2577_v5, 0.0 }
 0x626   : > { %v2620_v14 = vpack.c.bf16 %v2617_v50, %v2616_v9 }
 0x628   : > { %2772 = vmatmul.bf16.vlgmr.msrb.gmra.mxu3 %v2620_v14 }
 0x629   : > { %v2609_v36 = vpop.f32.mrf.mxu2  ;;  %v2579_v44 = vpop.f32.mrf.mxu0 }
 0x631   : > { %v2611_v55 = vpop.f32.mrf.mxu2  ;;  %v2580_v28 = vpop.f32.mrf.mxu0 }
 0x632   : > { %v2612_v39 = vadd.f32 %v2611_v55, %v2595_v58 }
 0x634   : > { %v2618_v48 = vmax.f32 %v2612_v39, 0.0 }
 0x639   : > { %v2613_v49 = vpop.f32.mrf.mxu2 }
 0x63a   : > { %v2614_v2 = vadd.f32 %v2613_v49, %v2597_v43 }
 0x63c   : > { %v2619_v34 = vmax.f32 %v2614_v2, 0.0 }
 0x63e   : > { %v2637_v40 = vpack.c.bf16 %v2619_v34, %v2618_v48 }
 0x640   : > { %2710 = vmatmul.bf16.vlgmr.msrb.gmra.mxu0 %v2637_v40 }
 0x6ab   : > { %v2773_v35 = vpop.f32.mrf.mxu3 }
 0x6b3   : > { %v2775_v51 = vpop.f32.mrf.mxu3 }
 0x6bd   : > { %v2711_v59 = vpop.f32.mrf.mxu0 }
 0x6be   : > { %v2774_v57 = vadd.f32 %v2773_v35, %v2711_v59 }
 0x6c0   : > { %v2782_v52 = vadd.f32 %v3803_v30, %v2774_v57 }
 0x6c2   : > { %v2784_v6 = vmax.f32 %v2782_v52, 0.0 }
 0x6c5   : > { %v2713_v41 = vpop.f32.mrf.mxu0 }
 0x6c6   : > { %v2776_v33 = vadd.f32 %v2775_v51, %v2713_v41 }
 0x6c8   : > { %v2783_v10 = vadd.f32 %v3803_v30, %v2776_v33 }
 0x6ca   : > { %v2785_v4 = vmax.f32 %v2783_v10, 0.0 }
 0x6cc   : > { %v2786_v54 = vpack.c.bf16 %v2785_v4, %v2784_v6 }
 0x6ce   : > { %2863 = vmatmul.bf16.vlgmr.msrb.gmra.mxu1 %v2786_v54 }
 0x74b   : > { %v2864_v27 = vpop.f32.mrf.mxu1 }
 0x74c   : > { %v2865_v11 = vadd.f32 %v3804_v63, %v2864_v27 }
 0x74e   : > { %v2869_v3 = vmax.f32 %v2865_v11, 0.0 }
 0x750   : > { %v2875_v37 = vmul.f32 %v3805_v23, %v2869_v3 }
 0x752   : > { %v2878_v56 = vsel %vm2877_vm12, %v2875_v37, 0.0 }
 0x753   : > { %v2866_v62 = vpop.f32.mrf.mxu1  ;;  %2879 = vadd.xlane.f32.xlu0 %v2878_v56 }
 0x754   : > { %v2867_v0 = vadd.f32 %v3804_v63, %v2866_v62 }
 0x756   : > { %v2870_v24 = vmax.f32 %v2867_v0, 0.0 }
 0x758   : > { %v2876_v38 = vmul.f32 %v3805_v23, %v2870_v24 }
 0x75a   : > { %v2881_v17 = vsel %vm2877_vm12, %v2876_v38, 0.0 }
 0x75b   : > { %2882 = vadd.xlane.f32.xlu1 %v2881_v17 }
 0x7c6   : > { %v2880_v22 = vpop.xlane.xlu0 %2879 }
 0x7c7   : > { %v2888_v32 = vadd.f32 %v3806_v42, %v2880_v22 }
 0x7c9   : > { %2891 = vst.msk [vmem:[%s753_s23] sm:$0xff] %vm2890_vm13, %v2888_v32 }
 0x7ce   : > { %v2883_v18 = vpop.xlane.xlu1 %2882 }
 0x7cf   : > { %v2889_v1 = vadd.f32 %v3806_v42, %v2883_v18 }
 0x7d1   : > { %2892 = vst.msk [vmem:[%s753_s23 + $0x8] sm:$0xff] %vm2890_vm13, %v2889_v1 }
 0x7d2 PF: > { %p33_p11 = scmp.ge.s32.totalorder %s4227_s29, 4   ;;  %s5286_s20 = smov %s4035_s21 }
 0x7d3   : > { %s5287_s21 = smov %s4039_s1  ;;  %s5288_s1 = smov %s4237_s17 }
 0x7d4   : > { %s5289_s22 = smov %s4227_s29  ;;  %35 = sbr.rel (!%p33_p11) target bundleno = 16 (0x10), region = 161 }
 0x7d9   :  { %2915 = vsyncpa [#allocation4], 1 }
 0x7da   :  { %2917 = vsyncpa [#allocation4 + $0x1], 1 }
 0x7db   :  { %2918 = vsyncpa [#allocation6], 1 }
 0x7dc   :  { %2919 = vsyncpa [#allocation9], 1 }

</bundles_post_ra>
